<compile_context>
chip_gen: v5e
topology: v5e:2x2
jax: 0.10.0
libtpu: 0.0.40
codegen_flags: <defaults>
</compile_context>

<pallas_src>
import functools

import jax
import jax.numpy as jnp
from jax.experimental import pallas as pl
from jax.experimental.pallas import tpu as pltpu


def _fused_down_mp_kernel(x_ref, w_ref, b_ref, gamma_ref, beta_ref, o_ref,
                          pad_ref, *, eps):
    """MaxPool2d(2) -> Conv3x3(pad=1) -> batch-stat BN -> ReLU for the whole batch.

    x_ref:     (N*Hp, 2, Wp, 2*Cin)  f32   pooling-window-exposed input
    w_ref:     (9*Cin, Cout)         bf16  conv weights, im2col layout
    b_ref:     (1, Cout)             f32   conv bias
    gamma_ref: (1, Cout)             f32   BN weight
    beta_ref:  (1, Cout)             f32   BN bias
    o_ref:     (N, Hp, Wp, Cout)     f32   output (NHWC)
    pad_ref:   (N, Hp+2, Wp+2, Cin)  f32   zero-padded conv input scratch
    """
    N, Hpad, Wpad, Cin = pad_ref.shape
    Hp, Wp = Hpad - 2, Wpad - 2
    Cout = w_ref.shape[-1]
    M = N * Hp * Wp

    # ---- MaxPool2d(2): two elementwise maxima ------------------------------
    x = x_ref[...]                                      # (N*Hp, 2, Wp, 2*Cin)
    h = jnp.maximum(x[:, 0], x[:, 1])                   # max over window rows
    xp = jnp.maximum(h[:, :, :Cin], h[:, :, Cin:])      # max over window cols
    # xp: (N*Hp, Wp, Cin)

    # ---- zero-padded buffer for padding=1 (interior overwritten below) -----
    pad_ref[...] = jnp.zeros_like(pad_ref)
    pad_ref[:, 1:Hp + 1, 1:Wp + 1, :] = xp.reshape(N, Hp, Wp, Cin)

    # ---- im2col: one (M, 9*Cin) patch matrix, single MXU matmul ------------
    taps = [pad_ref[:, dy:dy + Hp, dx:dx + Wp, :]
            for dy in range(3) for dx in range(3)]
    patch = jnp.concatenate(taps, axis=-1).reshape(M, 9 * Cin)
    acc = jnp.dot(patch.astype(w_ref.dtype), w_ref[...],
                  preferred_element_type=jnp.float32)   # (M, Cout) f32 accum
    acc = acc + b_ref[...]                              # conv bias broadcast

    # ---- BatchNorm2d (training-mode batch stats, biased var) + ReLU --------
    mean = jnp.sum(acc, axis=0, keepdims=True) / M      # (1, Cout)
    cent = acc - mean
    var = jnp.sum(cent * cent, axis=0, keepdims=True) / M   # >= 0 by construction
    scale = gamma_ref[...] * jax.lax.rsqrt(var + eps)
    shift = beta_ref[...] - mean * scale
    z = jnp.maximum(acc * scale + shift, 0.0)

    o_ref[...] = z.reshape(N, Hp, Wp, Cout).astype(o_ref.dtype)


@functools.partial(jax.jit, static_argnames=("eps",))
def down_mp_single_forward(x_nchw, w_oihw, bias, gamma, beta, eps=1e-5):
    """Equivalent of down_mp_single(in_channels, out_channels).forward(x)."""
    N, Cin, H, W = x_nchw.shape
    Cout = w_oihw.shape[0]
    Hp, Wp = H // 2, W // 2

    # ---- layout glue only (no compute) --------------------------------------
    # floor odd spatial dims like MaxPool2d(2), NCHW -> NHWC, then a free
    # contiguous reshape exposing the 2x2 pooling window to the kernel.
    x = x_nchw[:, :, :2 * Hp, :2 * Wp]
    x = jnp.transpose(x, (0, 2, 3, 1)).astype(jnp.float32)     # (N, 2Hp, 2Wp, Cin)
    x = x.reshape(N * Hp, 2, Wp, 2 * Cin)                      # free reshape

    # conv weights OIHW -> HWIO -> flat (9*Cin, Cout), bf16 for the MXU
    w2 = jnp.transpose(w_oihw, (2, 3, 1, 0)).reshape(9 * Cin, Cout)
    w2 = w2.astype(jnp.bfloat16)
    b2 = bias.reshape(1, Cout).astype(jnp.float32)
    g2 = gamma.reshape(1, Cout).astype(jnp.float32)
    be2 = beta.reshape(1, Cout).astype(jnp.float32)

    out_nhwc = pl.pallas_call(
        functools.partial(_fused_down_mp_kernel, eps=float(eps)),
        out_shape=jax.ShapeDtypeStruct((N, Hp, Wp, Cout), jnp.float32),
        scratch_shapes=[pltpu.VMEM((N, Hp + 2, Wp + 2, Cin), jnp.float32)],
    )(x, w2, b2, g2, be2)

    return jnp.transpose(out_nhwc, (0, 3, 1, 2))               # back to NCHW


def _reference(x_nchw, w_oihw, bias, gamma, beta, eps=1e-5):
    """Pure-JAX reference of the PyTorch forward (training-mode BN)."""
    xp = jnp.maximum(
        jnp.maximum(x_nchw[:, :, 0::2, 0::2], x_nchw[:, :, 0::2, 1::2]),
        jnp.maximum(x_nchw[:, :, 1::2, 0::2], x_nchw[:, :, 1::2, 1::2]))
    y = jax.lax.conv_general_dilated(
        xp, w_oihw, window_strides=(1, 1), padding=((1, 1), (1, 1)),
        dimension_numbers=("NCHW", "OIHW", "NCHW"))
    y = y + bias.reshape(1, -1, 1, 1)
    mean = y.mean(axis=(0, 2, 3), keepdims=True)
    var = y.var(axis=(0, 2, 3), keepdims=True)
    z = (y - mean) / jnp.sqrt(var + eps)
    z = z * gamma.reshape(1, -1, 1, 1) + beta.reshape(1, -1, 1, 1)
    return jnp.maximum(z, 0.0)


if __name__ == "__main__":
    N, Cin, Cout, H, W = 2, 4, 8, 16, 16

    key = jax.random.PRNGKey(0)
    kx, kw, kb = jax.random.split(key, 3)
    x = jax.random.normal(kx, (N, Cin, H, W), dtype=jnp.float32)
    w = 0.1 * jax.random.normal(kw, (Cout, Cin, 3, 3), dtype=jnp.float32)  # OIHW
    b = 0.05 * jax.random.normal(kb, (Cout,), dtype=jnp.float32)
    gamma = jnp.ones((Cout,), dtype=jnp.float32)   # BatchNorm2d default init
    beta = jnp.zeros((Cout,), dtype=jnp.float32)

    out = jax.block_until_ready(down_mp_single_forward(x, w, b, gamma, beta))
    ref = jax.block_until_ready(_reference(x, w, b, gamma, beta))

    assert out.shape == (N, Cout, H // 2, W // 2), out.shape
    # bf16 MXU inputs with f32 accumulation -> ~1e-3-level deviation vs f32 ref.
    assert jnp.allclose(out, ref, rtol=2e-2, atol=2e-2), float(
        jnp.max(jnp.abs(out - ref)))

    print("KERNEL_OK")
</pallas_src>

<mosaic_0001>
module attributes {stable_mosaic.version = 11 : i64} {
  func.func @_fused_down_mp_kernel(%arg0: memref<16x2x8x8xf32, #tpu.memory_space<vmem>>, %arg1: memref<36x8xbf16, #tpu.memory_space<vmem>>, %arg2: memref<1x8xf32, #tpu.memory_space<vmem>>, %arg3: memref<1x8xf32, #tpu.memory_space<vmem>>, %arg4: memref<1x8xf32, #tpu.memory_space<vmem>>, %arg5: memref<2x8x8x8xf32, #tpu.memory_space<vmem>>, %arg6: memref<2x10x10x4xf32, #tpu.memory_space<vmem>>) attributes {dimension_semantics = [], scalar_prefetch = 0 : i64, scratch_operands = 1 : i64, tpu.core_type = #tpu.core_type<tc>} {
    %c0 = arith.constant 0 : index
    %c0_0 = arith.constant 0 : index
    %c0_1 = arith.constant 0 : index
    %c0_2 = arith.constant 0 : index
    %0 = vector.load %arg0[%c0, %c0_0, %c0_1, %c0_2] : memref<16x2x8x8xf32, #tpu.memory_space<vmem>>, vector<16x2x8x8xf32>
    %1 = vector.extract_strided_slice %0 {offsets = [0, 0, 0, 0], sizes = [16, 1, 8, 8], strides = [1, 1, 1, 1]} : vector<16x2x8x8xf32> to vector<16x1x8x8xf32>
    %2 = vector.shape_cast %1 : vector<16x1x8x8xf32> to vector<16x8x8xf32>
    %3 = vector.extract_strided_slice %0 {offsets = [0, 1, 0, 0], sizes = [16, 1, 8, 8], strides = [1, 1, 1, 1]} : vector<16x2x8x8xf32> to vector<16x1x8x8xf32>
    %4 = vector.shape_cast %3 : vector<16x1x8x8xf32> to vector<16x8x8xf32>
    %5 = arith.maximumf %2, %4 : vector<16x8x8xf32>
    %6 = vector.extract_strided_slice %5 {offsets = [0, 0, 0], sizes = [16, 8, 4], strides = [1, 1, 1]} : vector<16x8x8xf32> to vector<16x8x4xf32>
    %7 = vector.extract_strided_slice %5 {offsets = [0, 0, 4], sizes = [16, 8, 4], strides = [1, 1, 1]} : vector<16x8x8xf32> to vector<16x8x4xf32>
    %8 = arith.maximumf %6, %7 : vector<16x8x4xf32>
    %cst = arith.constant 0.000000e+00 : f32
    %9 = vector.broadcast %cst : f32 to vector<2x10x10x4xf32>
    %c0_3 = arith.constant 0 : index
    %c0_4 = arith.constant 0 : index
    %c0_5 = arith.constant 0 : index
    %c0_6 = arith.constant 0 : index
    %10 = vector.load %arg6[%c0_3, %c0_4, %c0_5, %c0_6] : memref<2x10x10x4xf32, #tpu.memory_space<vmem>>, vector<2x10x10x4xf32>
    tpu.vector_store %arg6[%c0_3, %c0_4, %c0_5, %c0_6], %9 {strides = array<i32>} : memref<2x10x10x4xf32, #tpu.memory_space<vmem>>, vector<2x10x10x4xf32>,
    %11 = vector.shape_cast %8 : vector<16x8x4xf32> to vector<2x8x8x4xf32>
    %c0_7 = arith.constant 0 : index
    %c1 = arith.constant 1 : index
    %c1_8 = arith.constant 1 : index
    %c0_9 = arith.constant 0 : index
    %12 = vector.load %arg6[%c0_7, %c1, %c1_8, %c0_9] : memref<2x10x10x4xf32, #tpu.memory_space<vmem>>, vector<2x8x8x4xf32>
    tpu.vector_store %arg6[%c0_7, %c1, %c1_8, %c0_9], %11 {strides = array<i32>} : memref<2x10x10x4xf32, #tpu.memory_space<vmem>>, vector<2x8x8x4xf32>,
    %c0_10 = arith.constant 0 : index
    %c0_11 = arith.constant 0 : index
    %c0_12 = arith.constant 0 : index
    %c0_13 = arith.constant 0 : index
    %13 = vector.load %arg6[%c0_10, %c0_11, %c0_12, %c0_13] : memref<2x10x10x4xf32, #tpu.memory_space<vmem>>, vector<2x8x8x4xf32>
    %c0_14 = arith.constant 0 : index
    %c0_15 = arith.constant 0 : index
    %c1_16 = arith.constant 1 : index
    %c0_17 = arith.constant 0 : index
    %14 = vector.load %arg6[%c0_14, %c0_15, %c1_16, %c0_17] : memref<2x10x10x4xf32, #tpu.memory_space<vmem>>, vector<2x8x8x4xf32>
    %c0_18 = arith.constant 0 : index
    %c0_19 = arith.constant 0 : index
    %c2 = arith.constant 2 : index
    %c0_20 = arith.constant 0 : index
    %15 = vector.load %arg6[%c0_18, %c0_19, %c2, %c0_20] : memref<2x10x10x4xf32, #tpu.memory_space<vmem>>, vector<2x8x8x4xf32>
    %c0_21 = arith.constant 0 : index
    %c1_22 = arith.constant 1 : index
    %c0_23 = arith.constant 0 : index
    %c0_24 = arith.constant 0 : index
    %16 = vector.load %arg6[%c0_21, %c1_22, %c0_23, %c0_24] : memref<2x10x10x4xf32, #tpu.memory_space<vmem>>, vector<2x8x8x4xf32>
    %c0_25 = arith.constant 0 : index
    %c1_26 = arith.constant 1 : index
    %c1_27 = arith.constant 1 : index
    %c0_28 = arith.constant 0 : index
    %17 = vector.load %arg6[%c0_25, %c1_26, %c1_27, %c0_28] : memref<2x10x10x4xf32, #tpu.memory_space<vmem>>, vector<2x8x8x4xf32>
    %c0_29 = arith.constant 0 : index
    %c1_30 = arith.constant 1 : index
    %c2_31 = arith.constant 2 : index
    %c0_32 = arith.constant 0 : index
    %18 = vector.load %arg6[%c0_29, %c1_30, %c2_31, %c0_32] : memref<2x10x10x4xf32, #tpu.memory_space<vmem>>, vector<2x8x8x4xf32>
    %c0_33 = arith.constant 0 : index
    %c2_34 = arith.constant 2 : index
    %c0_35 = arith.constant 0 : index
    %c0_36 = arith.constant 0 : index
    %19 = vector.load %arg6[%c0_33, %c2_34, %c0_35, %c0_36] : memref<2x10x10x4xf32, #tpu.memory_space<vmem>>, vector<2x8x8x4xf32>
    %c0_37 = arith.constant 0 : index
    %c2_38 = arith.constant 2 : index
    %c1_39 = arith.constant 1 : index
    %c0_40 = arith.constant 0 : index
    %20 = vector.load %arg6[%c0_37, %c2_38, %c1_39, %c0_40] : memref<2x10x10x4xf32, #tpu.memory_space<vmem>>, vector<2x8x8x4xf32>
    %c0_41 = arith.constant 0 : index
    %c2_42 = arith.constant 2 : index
    %c2_43 = arith.constant 2 : index
    %c0_44 = arith.constant 0 : index
    %21 = vector.load %arg6[%c0_41, %c2_42, %c2_43, %c0_44] : memref<2x10x10x4xf32, #tpu.memory_space<vmem>>, vector<2x8x8x4xf32>
    %22 = tpu.concatenate %13, %14, %15, %16, %17, %18, %19, %20, %21 in 3 : vector<2x8x8x4xf32>, vector<2x8x8x4xf32>, vector<2x8x8x4xf32>, vector<2x8x8x4xf32>, vector<2x8x8x4xf32>, vector<2x8x8x4xf32>, vector<2x8x8x4xf32>, vector<2x8x8x4xf32>, vector<2x8x8x4xf32> -> vector<2x8x8x36xf32>
    %23 = vector.shape_cast %22 : vector<2x8x8x36xf32> to vector<128x36xf32>
    %24 = arith.truncf %23 : vector<128x36xf32> to vector<128x36xbf16>
    %c0_45 = arith.constant 0 : index
    %c0_46 = arith.constant 0 : index
    %25 = vector.load %arg1[%c0_45, %c0_46] : memref<36x8xbf16, #tpu.memory_space<vmem>>, vector<36x8xbf16>
    %cst_47 = arith.constant dense<0.000000e+00> : vector<128x8xf32>
    %26 = tpu.matmul %24, %25, %cst_47 {dimension_numbers = #tpu.dot_dimension_numbers<[1], [0], [0], [1], [0, 0, 1, 1], [], []>} : vector<128x36xbf16>, vector<36x8xbf16>, vector<128x8xf32> -> vector<128x8xf32>
    %c0_48 = arith.constant 0 : index
    %c0_49 = arith.constant 0 : index
    %27 = vector.load %arg2[%c0_48, %c0_49] : memref<1x8xf32, #tpu.memory_space<vmem>>, vector<1x8xf32>
    %28 = vector.broadcast %27 : vector<1x8xf32> to vector<128x8xf32>
    %29 = arith.addf %26, %28 : vector<128x8xf32>
    %cst_50 = arith.constant dense<0.000000e+00> : vector<8xf32>
    %30 = vector.multi_reduction <add>, %29, %cst_50 [0] : vector<128x8xf32> to vector<8xf32>
    %31 = vector.shape_cast %30 : vector<8xf32> to vector<1x8xf32>
    %cst_51 = arith.constant 1.280000e+02 : f32
    %32 = vector.broadcast %cst_51 : f32 to vector<1x8xf32>
    %33 = arith.divf %31, %32 : vector<1x8xf32>
    %34 = vector.broadcast %33 : vector<1x8xf32> to vector<128x8xf32>
    %35 = arith.subf %29, %34 : vector<128x8xf32>
    %36 = arith.mulf %35, %35 : vector<128x8xf32>
    %cst_52 = arith.constant dense<0.000000e+00> : vector<8xf32>
    %37 = vector.multi_reduction <add>, %36, %cst_52 [0] : vector<128x8xf32> to vector<8xf32>
    %38 = vector.shape_cast %37 : vector<8xf32> to vector<1x8xf32>
    %cst_53 = arith.constant 1.280000e+02 : f32
    %39 = vector.broadcast %cst_53 : f32 to vector<1x8xf32>
    %40 = arith.divf %38, %39 : vector<1x8xf32>
    %c0_54 = arith.constant 0 : index
    %c0_55 = arith.constant 0 : index
    %41 = vector.load %arg3[%c0_54, %c0_55] : memref<1x8xf32, #tpu.memory_space<vmem>>, vector<1x8xf32>
    %cst_56 = arith.constant 9.99999974E-6 : f32
    %42 = vector.broadcast %cst_56 : f32 to vector<1x8xf32>
    %43 = arith.addf %40, %42 : vector<1x8xf32>
    %44 = math.rsqrt %43 : vector<1x8xf32>
    %45 = arith.mulf %41, %44 : vector<1x8xf32>
    %c0_57 = arith.constant 0 : index
    %c0_58 = arith.constant 0 : index
    %46 = vector.load %arg4[%c0_57, %c0_58] : memref<1x8xf32, #tpu.memory_space<vmem>>, vector<1x8xf32>
    %47 = arith.mulf %33, %45 : vector<1x8xf32>
    %48 = arith.subf %46, %47 : vector<1x8xf32>
    %49 = vector.broadcast %45 : vector<1x8xf32> to vector<128x8xf32>
    %50 = arith.mulf %29, %49 : vector<128x8xf32>
    %51 = vector.broadcast %48 : vector<1x8xf32> to vector<128x8xf32>
    %52 = arith.addf %50, %51 : vector<128x8xf32>
    %cst_59 = arith.constant 0.000000e+00 : f32
    %53 = vector.broadcast %cst_59 : f32 to vector<128x8xf32>
    %54 = arith.maximumf %52, %53 : vector<128x8xf32>
    %55 = vector.shape_cast %54 : vector<128x8xf32> to vector<2x8x8x8xf32>
    %c0_60 = arith.constant 0 : index
    %c0_61 = arith.constant 0 : index
    %c0_62 = arith.constant 0 : index
    %c0_63 = arith.constant 0 : index
    %56 = vector.load %arg5[%c0_60, %c0_61, %c0_62, %c0_63] : memref<2x8x8x8xf32, #tpu.memory_space<vmem>>, vector<2x8x8x8xf32>
    tpu.vector_store %arg5[%c0_60, %c0_61, %c0_62, %c0_63], %55 {strides = array<i32>} : memref<2x8x8x8xf32, #tpu.memory_space<vmem>>, vector<2x8x8x8xf32>,
    return
  }
}

</mosaic_0001>

<bundles_post_ra>
// kernel: down_mp_single_forward.1
= control target key start
LH: loop header
LB: loop body
LE: loop exit
PB: predicated region body
PF: predicated region fallthrough
CT: control target
= control target key end

     0   :  { %s1678_s26 = smov 124   ;;  %vm149_vm0 = vcmask 31744   ;;  %vm151_vm1 = vcmask 25600   ;;  %v1679_v22 = vmov 0.0   ;;  %s1682_s10 = smov 12   ;;  %vm1057_vm2 = vcmask 1041408   ;;  %s2667_s0 = inlined_call_operand.vmem [shape: f32[16,2,8,8], index: 0, kind: input, shape index: {}]   ;;  %s2668_s1 = inlined_call_operand.vmem [shape: bf16[36,8], index: 1, kind: input, shape index: {}]   ;;  %s2669_s2 = inlined_call_operand.vmem [shape: f32[1,8], index: 2, kind: input, shape index: {}]   ;;  %s2670_s3 = inlined_call_operand.vmem [shape: f32[1,8], index: 3, kind: input, shape index: {}]   ;;  %s2671_s4 = inlined_call_operand.vmem [shape: f32[1,8], index: 4, kind: input, shape index: {}]   ;;  %s2672_s5 = inlined_call_operand.vmem [shape: f32[2,8,8,8], index: 5, kind: output, shape index: {}]  }
   0x1   :  { %v25_v0 = vld [vmem:[%s2667_s0 + $0x20] sm:$0xff]  ;;  %v26_v1 = vld [vmem:[%s2667_s0 + $0x28] sm:$0xff]  ;;  %v27_v6 = vld [vmem:[%s2667_s0 + $0x30] sm:$0xff]  ;;  %161 = vst.msk [vmem:[#allocation2 + $0x50] sm:$0xff] %vm149_vm0, %v1679_v22  ;;  %s1683_s11 = smov 20   ;;  %s1684_s12 = smov 24  }
   0x2   :  { %v21_v2 = vld [vmem:[%s2667_s0] sm:$0xff]  ;;  %v1728_v3 = vmax.f32 %v25_v0, %v26_v1  ;;  %v22_v4 = vld [vmem:[%s2667_s0 + $0x8] sm:$0xff]  ;;  %v28_v7 = vld [vmem:[%s2667_s0 + $0x38] sm:$0xff]  ;;  %162 = vst.msk [vmem:[#allocation2 + $0x58] sm:$0x3] %vm151_vm1, %v1679_v22  ;;  %s1685_s13 = smov 16  }
   0x3   :  { %v1733_v5 = vmax.f32 %v21_v2, %v22_v4  ;;  %v29_v8 = vld [vmem:[%s2667_s0 + $0x40] sm:$0xff]  ;;  %v30_v9 = vld [vmem:[%s2667_s0 + $0x48] sm:$0xff]  ;;  %v23_v10 = vld [vmem:[%s2667_s0 + $0x10] sm:$0xff]  ;;  %v1759_v13 = vmax.f32 %v27_v6, %v28_v7  ;;  %150 = vst.msk [vmem:[#allocation2] sm:$0xff] %vm149_vm0, %v1679_v22  ;;  %s1686_s14 = smov 32   ;;  %s1687_s15 = smov 28  }
   0x4   :  { %89 = vrot.lane.b32.xlu1 %v1728_v3, %s1678_s26  ;;  %v24_v11 = vld [vmem:[%s2667_s0 + $0x18] sm:$0xff]  ;;  %v1757_v12 = vmax.f32 %v29_v8, %v30_v9  ;;  %v31_v15 = vld [vmem:[%s2667_s0 + $0x50] sm:$0xff]  ;;  %v33_v20 = vld [vmem:[%s2667_s0 + $0x60] sm:$0xff]  ;;  %152 = vst.msk [vmem:[#allocation2 + $0x8] sm:$0x3] %vm151_vm1, %v1679_v22  ;;  %vm881_vm3 = vcmask 64512  }
   0x5   :  { %85 = vrot.lane.b32.xlu0 %v1733_v5, %s1678_s26  ;;  %v1763_v14 = vmax.f32 %v23_v10, %v24_v11  ;;  %v32_v16 = vld [vmem:[%s2667_s0 + $0x58] sm:$0xff]  ;;  %v35_v18 = vld [vmem:[%s2667_s0 + $0x70] sm:$0xff]  ;;  %v34_v21 = vld [vmem:[%s2667_s0 + $0x68] sm:$0xff]  ;;  %153 = vst.msk [vmem:[#allocation2 + $0x10] sm:$0xff] %vm149_vm0, %v1679_v22  ;;  %vm898_vm4 = vcmask 97280   ;;  %vm915_vm5 = vcmask 130048  }
   0x6   :  { %93 = vrot.lane.b32.xlu2 %v1757_v12, %s1678_s26  ;;  %v1773_v17 = vmax.f32 %v31_v15, %v32_v16  ;;  %v36_v19 = vld [vmem:[%s2667_s0 + $0x78] sm:$0xff]  ;;  %v1799_v24 = vmax.f32 %v33_v20, %v34_v21  ;;  %v37_v25 = vld [vmem:[%s2667_s0 + $0x80] sm:$0xff]  ;;  %v38_v26 = vld [vmem:[%s2667_s0 + $0x88] sm:$0xff]  ;;  %154 = vst.msk [vmem:[#allocation2 + $0x18] sm:$0x3] %vm151_vm1, %v1679_v22  ;;  %vm932_vm6 = vcmask 162816  }
   0x7   :  { %v1793_v23 = vmax.f32 %v35_v18, %v36_v19  ;;  %v1815_v27 = vmax.f32 %v37_v25, %v38_v26  ;;  %155 = vst.msk [vmem:[#allocation2 + $0x20] sm:$0xff] %vm149_vm0, %v1679_v22  ;;  %v41_v28 = vld [vmem:[%s2667_s0 + $0xa0] sm:$0xff]  ;;  %v42_v29 = vld [vmem:[%s2667_s0 + $0xa8] sm:$0xff]  ;;  %v39_v30 = vld [vmem:[%s2667_s0 + $0x90] sm:$0xff]  ;;  %vm949_vm7 = vcmask 195584   ;;  %vm966_vm8 = vcmask 228352  }
   0x8   :  { %156 = vst.msk [vmem:[#allocation2 + $0x28] sm:$0x3] %vm151_vm1, %v1679_v22  ;;  %v40_v31 = vld [vmem:[%s2667_s0 + $0x98] sm:$0xff]  ;;  %v1839_v32 = vmax.f32 %v41_v28, %v42_v29  ;;  %v43_v34 = vld [vmem:[%s2667_s0 + $0xb0] sm:$0xff]  ;;  %v45_v39 = vld [vmem:[%s2667_s0 + $0xc0] sm:$0xff]  ;;  %vm983_vm9 = vcmask 261120  }
   0x9   :  { %157 = vst.msk [vmem:[#allocation2 + $0x30] sm:$0xff] %vm149_vm0, %v1679_v22  ;;  %v1845_v33 = vmax.f32 %v39_v30, %v40_v31  ;;  %v44_v35 = vld [vmem:[%s2667_s0 + $0xb8] sm:$0xff]  ;;  %v47_v37 = vld [vmem:[%s2667_s0 + $0xd0] sm:$0xff]  ;;  %v46_v40 = vld [vmem:[%s2667_s0 + $0xc8] sm:$0xff]  ;;  %vm1032_vm10 = vcmask 293888  }
   0xa   :  { %158 = vst.msk [vmem:[#allocation2 + $0x38] sm:$0x3] %vm151_vm1, %v1679_v22  ;;  %v1861_v36 = vmax.f32 %v43_v34, %v44_v35  ;;  %v48_v38 = vld [vmem:[%s2667_s0 + $0xd8] sm:$0xff]  ;;  %v1891_v42 = vmax.f32 %v45_v39, %v46_v40  ;;  %v49_v43 = vld [vmem:[%s2667_s0 + $0xe0] sm:$0xff]  ;;  %v50_v44 = vld [vmem:[%s2667_s0 + $0xe8] sm:$0xff] }
   0xb   :  { %159 = vst.msk [vmem:[#allocation2 + $0x40] sm:$0xff] %vm149_vm0, %v1679_v22  ;;  %v1885_v41 = vmax.f32 %v47_v37, %v48_v38  ;;  %v67_v45 = vmax.f32 %v49_v43, %v50_v44  ;;  %v51_v46 = vld [vmem:[%s2667_s0 + $0xf0] sm:$0xff]  ;;  %v52_v47 = vld [vmem:[%s2667_s0 + $0xf8] sm:$0xff]  ;;  %v224_v0 = vld [vmem:[#allocation2 + $0x1] sm:$0xff]  ;;  %s1680_s0 = smov 4  }
   0xc   :  { %91 = vrot.lane.b32.xlu1 %v1759_v13, %s1678_s26  ;;  %160 = vst.msk [vmem:[#allocation2 + $0x48] sm:$0x3] %vm151_vm1, %v1679_v22  ;;  %v1926_v48 = vmax.f32 %v51_v46, %v52_v47  ;;  %v240_v37 = vld [vmem:[#allocation2 + $0x2] sm:$0xff] }
   0xd   :  { %87 = vrot.lane.b32.xlu0 %v1763_v14, %s1678_s26  ;;  %163 = vst.msk [vmem:[#allocation2 + $0x60] sm:$0xff] %vm149_vm0, %v1679_v22 }
   0xe   :  { %95 = vrot.lane.b32.xlu2 %v1773_v17, %s1678_s26  ;;  %164 = vst.msk [vmem:[#allocation2 + $0x68] sm:$0x3] %vm151_vm1, %v1679_v22 }
   0xf   :  { %165 = vst.msk [vmem:[#allocation2 + $0x70] sm:$0xff] %vm149_vm0, %v1679_v22 }
  0x10   :  { %166 = vst.msk [vmem:[#allocation2 + $0x78] sm:$0x3] %vm151_vm1, %v1679_v22 }
  0x11   :  { %167 = vst.msk [vmem:[#allocation2 + $0x80] sm:$0xff] %vm149_vm0, %v1679_v22 }
  0x12   :  { %168 = vst.msk [vmem:[#allocation2 + $0x88] sm:$0x3] %vm151_vm1, %v1679_v22 }
  0x13   :  { %169 = vst.msk [vmem:[#allocation2 + $0x90] sm:$0xff] %vm149_vm0, %v1679_v22 }
  0x14   :  { %99 = vrot.lane.b32.xlu1 %v1793_v23, %s1678_s26  ;;  %170 = vst.msk [vmem:[#allocation2 + $0x98] sm:$0x3] %vm151_vm1, %v1679_v22 }
  0x15   :  { %97 = vrot.lane.b32.xlu0 %v1799_v24, %s1678_s26  ;;  %171 = vst.msk [vmem:[#allocation2 + $0xa0] sm:$0xff] %vm149_vm0, %v1679_v22 }
  0x16   :  { %101 = vrot.lane.b32.xlu2 %v1815_v27, %s1678_s26  ;;  %172 = vst.msk [vmem:[#allocation2 + $0xa8] sm:$0x3] %vm151_vm1, %v1679_v22 }
  0x17   :  { %173 = vst.msk [vmem:[#allocation2 + $0xb0] sm:$0xff] %vm149_vm0, %v1679_v22 }
  0x18   :  { %174 = vst.msk [vmem:[#allocation2 + $0xb8] sm:$0x3] %vm151_vm1, %v1679_v22 }
  0x19   :  { %175 = vst.msk [vmem:[#allocation2 + $0xc0] sm:$0xff] %vm149_vm0, %v1679_v22 }
  0x1a   :  { %176 = vst.msk [vmem:[#allocation2 + $0xc8] sm:$0x3] %vm151_vm1, %v1679_v22 }
  0x1b   :  { %177 = vst.msk [vmem:[#allocation2 + $0xd0] sm:$0xff] %vm149_vm0, %v1679_v22 }
  0x1c   :  { %105 = vrot.lane.b32.xlu1 %v1839_v32, %s1678_s26  ;;  %178 = vst.msk [vmem:[#allocation2 + $0xd8] sm:$0x3] %vm151_vm1, %v1679_v22 }
  0x1d   :  { %103 = vrot.lane.b32.xlu0 %v1845_v33, %s1678_s26  ;;  %179 = vst.msk [vmem:[#allocation2 + $0xe0] sm:$0xff] %vm149_vm0, %v1679_v22 }
  0x1e   :  { %107 = vrot.lane.b32.xlu2 %v1861_v36, %s1678_s26  ;;  %180 = vst.msk [vmem:[#allocation2 + $0xe8] sm:$0x3] %vm151_vm1, %v1679_v22 }
  0x1f   :  { %181 = vst.msk [vmem:[#allocation2 + $0xf0] sm:$0xff] %vm149_vm0, %v1679_v22 }
  0x20   :  { %182 = vst.msk [vmem:[#allocation2 + $0xf8] sm:$0x3] %vm151_vm1, %v1679_v22 }
  0x21   :  { %183 = vst.msk [vmem:[#allocation2 + $0x100] sm:$0xff] %vm149_vm0, %v1679_v22 }
  0x22   :  { %184 = vst.msk [vmem:[#allocation2 + $0x108] sm:$0x3] %vm151_vm1, %v1679_v22 }
  0x23   :  { %185 = vst.msk [vmem:[#allocation2 + $0x110] sm:$0xff] %vm149_vm0, %v1679_v22 }
  0x24   :  { %111 = vrot.lane.b32.xlu1 %v1885_v41, %s1678_s26  ;;  %186 = vst.msk [vmem:[#allocation2 + $0x118] sm:$0x3] %vm151_vm1, %v1679_v22 }
  0x25   :  { %109 = vrot.lane.b32.xlu0 %v1891_v42, %s1678_s26  ;;  %187 = vst.msk [vmem:[#allocation2 + $0x120] sm:$0xff] %vm149_vm0, %v1679_v22 }
  0x26   :  { %113 = vrot.lane.b32.xlu2 %v67_v45, %s1678_s26  ;;  %188 = vst.msk [vmem:[#allocation2 + $0x128] sm:$0x3] %vm151_vm1, %v1679_v22 }
  0x27   :  { %189 = vst.msk [vmem:[#allocation2 + $0x130] sm:$0xff] %vm149_vm0, %v1679_v22 }
  0x28   :  { %190 = vst.msk [vmem:[#allocation2 + $0x138] sm:$0x3] %vm151_vm1, %v1679_v22 }
  0x2d   :  { %115 = vrot.lane.b32.xlu0 %v1926_v48, %s1678_s26  ;;  %s1681_s26 = smov 8  }
  0x60   :  { %v94_v49 = vpop.permute.xlu2 %93 }
  0x61   :  { %v137_v50 = vmax.f32 %v1757_v12, %v94_v49 }
  0x63   :  { %196 = vst.msk [vmem:[#allocation2 + $0x51] sm:$0xff] %vm149_vm0, %v137_v50 }
  0x68   :  { %v96_v51 = vpop.permute.xlu2 %95 }
  0x69   :  { %v138_v52 = vmax.f32 %v1773_v17, %v96_v51  ;;  %v232_v17 = vld [vmem:[#allocation2 + $0xa1] sm:$0xff] }
  0x6a   :  { %v1977_v7 = vld [vmem:[#allocation2 + $0x51] sm:$0xff] }
  0x6b   :  { %197 = vst.msk [vmem:[#allocation2 + $0x61] sm:$0xff] %vm149_vm0, %v138_v52 }
  0x70   :  { %v102_v53 = vpop.permute.xlu2 %101 }
  0x71   :  { %v141_v54 = vmax.f32 %v1815_v27, %v102_v53 }
  0x73   :  { %200 = vst.msk [vmem:[#allocation2 + $0xb1] sm:$0xff] %vm149_vm0, %v141_v54 }
  0x76   :  { %v90_v55 = vpop.permute.xlu1 %89 }
  0x77   :  { %v135_v56 = vmax.f32 %v1728_v3, %v90_v55  ;;  %v86_v57 = vpop.permute.xlu0 %85 }
  0x78   :  { %v133_v58 = vmax.f32 %v1733_v5, %v86_v57  ;;  %v108_v59 = vpop.permute.xlu2 %107 }
  0x79   :  { %194 = vst.msk [vmem:[#allocation2 + $0x31] sm:$0xff] %vm149_vm0, %v135_v56  ;;  %v144_v60 = vmax.f32 %v1861_v36, %v108_v59 }
  0x7a   :  { %192 = vst.msk [vmem:[#allocation2 + $0x11] sm:$0xff] %vm149_vm0, %v133_v58  ;;  %v2003_v18 = vld [vmem:[#allocation2 + $0xb1] sm:$0xff] }
  0x7b   :  { %203 = vst.msk [vmem:[#allocation2 + $0xe1] sm:$0xff] %vm149_vm0, %v144_v60  ;;  %v2089_v60 = vld [vmem:[#allocation2 + $0x50] sm:$0xff] }
  0x7e   :  { %v92_v61 = vpop.permute.xlu1 %91 }
  0x7f   :  { %v136_v62 = vmax.f32 %v1759_v13, %v92_v61  ;;  %v88_v63 = vpop.permute.xlu0 %87  ;;  %v2091_v61 = vld [vmem:[#allocation2 + $0x60] sm:$0xff] }
  0x80   :  { %v134_v1 = vmax.f32 %v1763_v14, %v88_v63  ;;  %v114_v4 = vpop.permute.xlu2 %113  ;;  %v1979_v8 = vld [vmem:[#allocation2 + $0x31] sm:$0xff]  ;;  %v248_v63 = vld [vmem:[#allocation2 + $0xa2] sm:$0xff] }
  0x81   :  { %195 = vst.msk [vmem:[#allocation2 + $0x41] sm:$0xff] %vm149_vm0, %v136_v62  ;;  %v1971_v2 = vld [vmem:[#allocation2 + $0x11] sm:$0xff]  ;;  %v147_v5 = vmax.f32 %v67_v45, %v114_v4  ;;  %v1438_v62 = vpack.i.bf16 %v2091_v61, %v2089_v60 }
  0x82   :  { %193 = vst.msk [vmem:[#allocation2 + $0x21] sm:$0xff] %vm149_vm0, %v134_v1  ;;  %v1353_v3 = vpack.i.bf16 %v1971_v2, %v224_v0  ;;  %v2021_v28 = vld [vmem:[#allocation2 + $0xe1] sm:$0xff]  ;;  %v241_v38 = vld [vmem:[#allocation2 + $0x12] sm:$0xff] }
  0x83   :  { %206 = vst.msk [vmem:[#allocation2 + $0x111] sm:$0xff] %vm149_vm0, %v147_v5  ;;  %v1393_v44 = vpack.i.bf16 %v241_v38, %v240_v37  ;;  %v2066_v51 = vld [vmem:[#allocation2 + $0x32] sm:$0xff] }
  0x84   :  { %1354 = vrot.lane.b32.xlu1 %v1353_v3, %s1680_s0  ;;  %v2071_v53 = vld [vmem:[#allocation2 + $0x10] sm:$0xff] }
  0x85   :  { %v2080_v56 = vld [vmem:[#allocation2 + $0x30] sm:$0xff] }
  0x86   :  { %v100_v6 = vpop.permute.xlu1 %99  ;;  %v2099_v0 = vld [vmem:[#allocation2 + $0xb0] sm:$0xff] }
  0x87   :  { %v140_v9 = vmax.f32 %v1793_v23, %v100_v6  ;;  %v98_v10 = vpop.permute.xlu0 %97  ;;  %v1373_v23 = vpack.i.bf16 %v2003_v18, %v232_v17 }
  0x88   :  { %v139_v11 = vmax.f32 %v1799_v24, %v98_v10  ;;  %v1983_v12 = vld [vmem:[#allocation2 + $0x41] sm:$0xff] }
  0x89   :  { %199 = vst.msk [vmem:[#allocation2 + $0x81] sm:$0xff] %vm149_vm0, %v140_v9  ;;  %v1988_v13 = vpack.i.bf16 %v1977_v7, %v1983_v12  ;;  %v1990_v14 = vld [vmem:[#allocation2 + $0x21] sm:$0xff]  ;;  %v1513_v15 = vpack.i.bf16 %v1983_v12, %v1979_v8 }
  0x8a   :  { %198 = vst.msk [vmem:[#allocation2 + $0x71] sm:$0xff] %vm149_vm0, %v139_v11  ;;  %v1997_v16 = vpack.i.bf16 %v1979_v8, %v1990_v14  ;;  %v2009_v24 = vld [vmem:[#allocation2 + $0x61] sm:$0xff]  ;;  %v2039_v36 = vld [vmem:[#allocation2 + $0x111] sm:$0xff]  ;;  %v1413_v59 = vpack.i.bf16 %v1990_v14, %v1971_v2 }
  0x8b   :  { %1364 = vrot.lane.b32.xlu0 %v1988_v13, %s1680_s0  ;;  %v2062_v47 = vld [vmem:[#allocation2 + $0x42] sm:$0xff]  ;;  %v249_v2 = vld [vmem:[#allocation2 + $0xb2] sm:$0xff]  ;;  %v1448_v3 = vpack.i.bf16 %v2009_v24, %v1977_v7 }
  0x8c   :  { %1359 = vrot.lane.b32.xlu2 %v1997_v16, %s1680_s0  ;;  %v2064_v49 = vld [vmem:[#allocation2 + $0x20] sm:$0xff]  ;;  %v1443_v5 = vpack.i.bf16 %v249_v2, %v248_v63  ;;  %v1332_v63 = vld [vmem:[%s2668_s1 + $0x8] sm:$0xff] }
  0x8d   :  { %v242_v50 = vld [vmem:[#allocation2 + $0x22] sm:$0xff]  ;;  %v1408_v54 = vpack.i.bf16 %v2064_v49, %v2071_v53  ;;  %v1423_v58 = vpack.i.bf16 %v2080_v56, %v2064_v49 }
  0x8e   :  { %v106_v19 = vpop.permute.xlu1 %105  ;;  %v1398_v55 = vpack.i.bf16 %v2066_v51, %v242_v50  ;;  %v1418_v57 = vpack.i.bf16 %v242_v50, %v241_v38  ;;  %v293_v9 = vld [vmem:[#allocation2 + $0x62] sm:$0xff] }
  0x8f   :  { %v143_v20 = vmax.f32 %v1839_v32, %v106_v19  ;;  %v104_v21 = vpop.permute.xlu0 %103 }
  0x90   :  { %v142_v22 = vmax.f32 %v1845_v33, %v104_v21 }
  0x91   :  { %202 = vst.msk [vmem:[#allocation2 + $0xd1] sm:$0xff] %vm149_vm0, %v143_v20  ;;  %v2011_v25 = vld [vmem:[#allocation2 + $0x71] sm:$0xff] }
  0x92   :  { %201 = vst.msk [vmem:[#allocation2 + $0xc1] sm:$0xff] %vm149_vm0, %v142_v22  ;;  %v2016_v26 = vpack.i.bf16 %v2011_v25, %v2009_v24  ;;  %v2110_v6 = vld [vmem:[#allocation2 + $0x70] sm:$0xff] }
  0x93   :  { %v1468_v11 = vpack.i.bf16 %v2110_v6, %v2091_v61  ;;  %v2129_v20 = vld [vmem:[#allocation2 + $0x72] sm:$0xff] }
  0x94   :  { %1374 = vrot.lane.b32.xlu2 %v1373_v23, %s1680_s0  ;;  %1369 = vrot.lane.b32.xlu1 %v2016_v26, %s1680_s0  ;;  %v1488_v22 = vpack.i.bf16 %v2129_v20, %v293_v9  ;;  %v2137_v23 = vld [vmem:[#allocation2 + $0xe2] sm:$0xff] }
  0x96   :  { %v112_v27 = vpop.permute.xlu1 %111 }
  0x97   :  { %v146_v29 = vmax.f32 %v1885_v41, %v112_v27  ;;  %v110_v30 = vpop.permute.xlu0 %109 }
  0x98   :  { %v145_v31 = vmax.f32 %v1891_v42, %v110_v30  ;;  %v2025_v32 = vld [vmem:[#allocation2 + $0xd1] sm:$0xff] }
  0x99   :  { %205 = vst.msk [vmem:[#allocation2 + $0x101] sm:$0xff] %vm149_vm0, %v146_v29  ;;  %v2028_v33 = vld [vmem:[#allocation2 + $0xc1] sm:$0xff]  ;;  %v1598_v34 = vpack.i.bf16 %v2021_v28, %v2025_v32  ;;  %v2119_v14 = vld [vmem:[#allocation2 + $0xd0] sm:$0xff] }
  0x9a   :  { %204 = vst.msk [vmem:[#allocation2 + $0xf1] sm:$0xff] %vm149_vm0, %v145_v31  ;;  %v2035_v35 = vpack.i.bf16 %v2025_v32, %v2028_v33  ;;  %v2101_v1 = vld [vmem:[#allocation2 + $0xc0] sm:$0xff]  ;;  %v1463_v10 = vpack.i.bf16 %v2028_v33, %v2003_v18  ;;  %v2127_v18 = vld [vmem:[#allocation2 + $0xd2] sm:$0xff]  ;;  %v1523_v33 = vpack.i.bf16 %v2062_v47, %v2066_v51 }
  0x9b   :  { %v1453_v4 = vpack.i.bf16 %v2101_v1, %v2099_v0  ;;  %v1483_v17 = vpack.i.bf16 %v2119_v14, %v2101_v1  ;;  %v279_v51 = vld [vmem:[#allocation2 + $0x81] sm:$0xff] }
  0x9c   :  { %1379 = vrot.lane.b32.xlu0 %v2035_v35, %s1680_s0 }
  0x9f   :  { %v116_v39 = vpop.permute.xlu0 %115 }
  0xa0   :  { %v2041_v40 = vld [vmem:[#allocation2 + $0x101] sm:$0xff]  ;;  %v148_v41 = vmax.f32 %v1926_v48, %v116_v39  ;;  %v245_v48 = vld [vmem:[#allocation2 + $0x52] sm:$0xff] }
  0xa1   :  { %v2046_v42 = vpack.i.bf16 %v2039_v36, %v2041_v40  ;;  %v2048_v43 = vld [vmem:[#allocation2 + $0xf1] sm:$0xff]  ;;  %v2069_v52 = vpack.i.bf16 %v245_v48, %v2062_v47  ;;  %v1458_v7 = vpack.i.bf16 %v293_v9, %v245_v48  ;;  %v2155_v31 = vld [vmem:[#allocation2 + $0x100] sm:$0xff] }
  0xa2   :  { %v2052_v45 = vpack.i.bf16 %v2048_v43, %v2021_v28  ;;  %207 = vst.msk [vmem:[#allocation2 + $0x121] sm:$0xff] %vm149_vm0, %v148_v41  ;;  %v1528_v46 = vpack.i.bf16 %v2041_v40, %v2048_v43  ;;  %v253_v24 = vld [vmem:[#allocation2 + $0xf2] sm:$0xff]  ;;  %v301_v8 = vld [vmem:[#allocation2 + $0x102] sm:$0xff]  ;;  %v1012_v47 = vld [vmem:[%s2668_s1 + $0x10] sm:$0x3]  ;;  %v1608_v28 = vpack.i.bf16 %v2137_v23, %v2127_v18 }
  0xa3   :  { %1389 = vrot.lane.b32.xlu2 %v2046_v42, %s1680_s0  ;;  %v2142_v27 = vpack.i.bf16 %v253_v24, %v2137_v23  ;;  %v2153_v30 = vld [vmem:[#allocation2 + $0xf0] sm:$0xff]  ;;  %v1538_v12 = vpack.i.bf16 %v301_v8, %v253_v24  ;;  %v263_v43 = vld [vmem:[#allocation2 + $0x80] sm:$0xff] }
  0xa4   :  { %1394 = vrot.lane.b32.xlu0 %v1393_v44, %s1681_s26  ;;  %1384 = vrot.lane.b32.xlu1 %v2052_v45, %s1680_s0  ;;  %v2177_v39 = vld [vmem:[#allocation2 + $0x110] sm:$0xff] }
  0xa5   :  { %v1548_v40 = vpack.i.bf16 %v2177_v39, %v2155_v31 }
  0xab   :  { %1404 = vrot.lane.b32.xlu2 %v2069_v52, %s1681_s26 }
  0xac   :  { %1409 = vrot.lane.b32.xlu0 %v1408_v54, %s1682_s10  ;;  %1399 = vrot.lane.b32.xlu1 %v1398_v55, %s1681_s26  ;;  %v2207_v54 = vld [vmem:[#allocation2 + $0xe0] sm:$0xff] }
  0xb3   :  { %1419 = vrot.lane.b32.xlu2 %v1418_v57, %s1683_s11  ;;  %v1583_v57 = vpack.i.bf16 %v279_v51, %v2011_v25 }
  0xb4   :  { %1424 = vrot.lane.b32.xlu0 %v1423_v58, %s1684_s12  ;;  %1414 = vrot.lane.b32.xlu1 %v1413_v59, %s1685_s13  ;;  %v1588_v58 = vpack.i.bf16 %v2207_v54, %v2119_v14 }
  0xbb   :  { %1434 = vrot.lane.b32.xlu2 %v1398_v55, %s1686_s14 }
  0xbc   :  { %1439 = vrot.lane.b32.xlu0 %v1438_v62, %s1682_s10  ;;  %1429 = vrot.lane.b32.xlu1 %v1997_v16, %s1687_s15  ;;  %v297_v16 = vld [vmem:[#allocation2 + $0xc2] sm:$0xff] }
  0xbd   :  { %v1473_v19 = vpack.i.bf16 %v297_v16, %v249_v2  ;;  %v1498_v21 = vpack.i.bf16 %v2127_v18, %v297_v16 }
  0xc3   :  { %1449 = vrot.lane.b32.xlu2 %v1448_v3, %s1685_s13  ;;  %v312_v3 = vld [vmem:[#allocation2 + $0x90] sm:$0xff] }
  0xc4   :  { %1454 = vrot.lane.b32.xlu0 %v1453_v4, %s1682_s10  ;;  %1444 = vrot.lane.b32.xlu1 %v1443_v5, %s1681_s26  ;;  %v295_v4 = vld [vmem:[#allocation2 + $0x82] sm:$0xff]  ;;  %v1603_v9 = vpack.i.bf16 %v312_v3, %v263_v43 }
  0xc5   :  { %v1331_v5 = vld [vmem:[%s2668_s1] sm:$0xff] }
  0xcb   :  { %1464 = vrot.lane.b32.xlu2 %v1463_v10, %s1685_s13  ;;  %v1593_v10 = vpack.i.bf16 %v295_v4, %v2129_v20  ;;  %v1618_v20 = vpack.i.bf16 %v2153_v30, %v2207_v54 }
  0xcc   :  { %1469 = vrot.lane.b32.xlu0 %v1468_v11, %s1684_s12  ;;  %1459 = vrot.lane.b32.xlu1 %v1458_v7, %s1683_s11 }
  0xd3   :  { %1479 = vrot.lane.b32.xlu2 %v2016_v26, %s1687_s15  ;;  %v2139_v26 = vld [vmem:[#allocation2 + $0x40] sm:$0xff] }
  0xd4   :  { %1484 = vrot.lane.b32.xlu0 %v1483_v17, %s1684_s12  ;;  %1474 = vrot.lane.b32.xlu1 %v1473_v19, %s1683_s11  ;;  %v1503_v29 = vpack.i.bf16 %v2139_v26, %v2080_v56  ;;  %v328_v17 = vld [vmem:[#allocation2 + $0x91] sm:$0xff] }
  0xd5   :  { %v1613_v19 = vpack.i.bf16 %v328_v17, %v279_v51 }
  0xdb   :  { %1494 = vrot.lane.b32.xlu2 %v2035_v35, %s1687_s15  ;;  %v1518_v35 = vpack.i.bf16 %v2155_v31, %v2153_v30 }
  0xdc   :  { %1499 = vrot.lane.b32.xlu0 %v1498_v21, %s1686_s14  ;;  %1489 = vrot.lane.b32.xlu1 %v1488_v22, %s1686_s14 }
  0xe3   :  { %1509 = vrot.lane.b32.xlu2 %v2142_v27, %s1681_s26 }
  0xe4   :  { %1514 = vrot.lane.b32.xlu0 %v1513_v15, %s1685_s13  ;;  %1504 = vrot.lane.b32.xlu1 %v1503_v29, %s1682_s10  ;;  %v1533_v15 = vpack.i.bf16 %v2089_v60, %v2139_v26 }
  0xe6   :  { %v2161_v37 = vpop.permute.xlu2 %1359 }
  0xe7   :  { %v1362_v32 = vunpack.i.h.bf16 %v2161_v37 }
  0xe9   :  { %v868_v18 = vsel %vm149_vm0, %v2080_v56, %v1362_v32 }
  0xeb   :  { %1524 = vrot.lane.b32.xlu2 %v1523_v33, %s1683_s11 }
  0xec   :  { %1529 = vrot.lane.b32.xlu0 %v1528_v46, %s1685_s13  ;;  %1519 = vrot.lane.b32.xlu1 %v1518_v35, %s1682_s10  ;;  %v1573_v46 = vpack.i.bf16 %v263_v43, %v2110_v6  ;;  %v344_v35 = vld [vmem:[#allocation2 + $0x92] sm:$0xff] }
  0xee   :  { %v2175_v38 = vpop.permute.xlu2 %1374 }
  0xf3   :  { %1539 = vrot.lane.b32.xlu2 %v1538_v12, %s1683_s11 }
  0xf4   :  { %1544 = vrot.lane.b32.xlu0 %v1988_v13, %s1687_s15  ;;  %1534 = vrot.lane.b32.xlu1 %v1533_v15, %s1684_s12  ;;  %v2188_v13 = vld [vmem:[#allocation2 + $0x112] sm:$0xff]  ;;  %v1623_v15 = vpack.i.bf16 %v344_v35, %v295_v4 }
  0xf5   :  { %v2191_v44 = vpack.i.bf16 %v2188_v13, %v301_v8 }
  0xf6   :  { %v2203_v48 = vpop.permute.xlu1 %1354 }
  0xf7   :  { %v1356_v12 = vunpack.i.l.bf16 %v2203_v48  ;;  %v1357_v43 = vunpack.i.h.bf16 %v2203_v48  ;;  %v271_v48 = vld [vmem:[#allocation2 + $0x120] sm:$0xff] }
  0xfb   :  { %1554 = vrot.lane.b32.xlu2 %v2069_v52, %s1686_s14  ;;  %v1026_v52 = vunpack.c.l.b16 %v1012_v47 }
  0xfc   :  { %1559 = vrot.lane.b32.xlu0 %v2046_v42, %s1687_s15  ;;  %1549 = vrot.lane.b32.xlu1 %v1548_v40, %s1684_s12  ;;  %v208_v40 = vld [vmem:[#allocation2] sm:$0xff] }
  0xfd   :  { %v2186_v41 = vpop.permute.xlu2 %1389  ;;  %v2205_v50 = vpop.permute.xlu0 %1364  ;;  %v1029_v55 = vpack.c.b16 %v1026_v52, %v1026_v52  ;;  %v865_v52 = vsel %vm149_vm0, %v208_v40, %v1356_v12 }
  0xff   :  { %v1059_v59 = vsel %vm1057_vm2, %v1029_v55, 0 }
 0x100   :  { %1066 = vmatpush.bf16.msra.mxu0 %v1059_v59  ;;  %1333 = vmatpush.bf16.msra.mxu1 %v1059_v59 }
 0x101   :  { %1334 = vmatpush.bf16.msra.mxu2 %v1059_v59  ;;  %1335 = vmatpush.bf16.msra.mxu3 %v1059_v59 }
 0x103   :  { %1569 = vrot.lane.b32.xlu2 %v2191_v44, %s1686_s14 }
 0x104   :  { %1574 = vrot.lane.b32.xlu0 %v1573_v46, %s1682_s10  ;;  %1564 = vrot.lane.b32.xlu1 %v1488_v22, %s1681_s26 }
 0x105   :  { %v2198_v42 = vpop.permute.xlu2 %1404  ;;  %1067 = vmatpush.bf16.msra.mxu0 %v1332_v63  ;;  %1336 = vmatpush.bf16.msra.mxu1 %v1332_v63 }
 0x106   :  { %v2220_v25 = vpop.permute.xlu1 %1369  ;;  %1337 = vmatpush.bf16.msra.mxu2 %v1332_v63  ;;  %1338 = vmatpush.bf16.msra.mxu3 %v1332_v63  ;;  %v287_v63 = vld [vmem:[#allocation2 + $0x121] sm:$0xff] }
 0x109   :  { %1068 = vmatpush.bf16.msra.mxu0 %v1331_v5  ;;  %1339 = vmatpush.bf16.msra.mxu1 %v1331_v5 }
 0x10a   :  { %1340 = vmatpush.bf16.msra.mxu2 %v1331_v5  ;;  %1341 = vmatpush.bf16.msra.mxu3 %v1331_v5 }
 0x10b   :  { %1584 = vrot.lane.b32.xlu2 %v1583_v57, %s1685_s13 }
 0x10c   :  { %1589 = vrot.lane.b32.xlu0 %v1588_v58, %s1682_s10  ;;  %1579 = vrot.lane.b32.xlu1 %v1498_v21, %s1681_s26 }
 0x10d   :  { %v2215_v62 = vpop.permute.xlu2 %1419 }
 0x10e   :  { %v2222_v2 = vpop.permute.xlu0 %1379  ;;  %v1422_v17 = vunpack.i.h.bf16 %v2215_v62 }
 0x113   :  { %1599 = vrot.lane.b32.xlu2 %v1598_v34, %s1685_s13  ;;  %v1361_v34 = vunpack.i.l.bf16 %v2161_v37 }
 0x114   :  { %1604 = vrot.lane.b32.xlu0 %v1603_v9, %s1684_s12  ;;  %1594 = vrot.lane.b32.xlu1 %v1593_v10, %s1683_s11  ;;  %v1643_v9 = vpack.i.bf16 %v271_v48, %v2177_v39 }
 0x115   :  { %v2234_v11 = vpop.permute.xlu2 %1434  ;;  %v867_v23 = vsel %vm149_vm0, %v2064_v49, %v1361_v34 }
 0x116   :  { %v2236_v7 = vpop.permute.xlu1 %1384  ;;  %v1395_v16 = vpop.permute.xlu0 %1394 }
 0x117   :  { %v1397_v56 = vunpack.i.h.bf16 %v1395_v16  ;;  %v1396_v46 = vunpack.i.l.bf16 %v1395_v16 }
 0x119   :  { %v882_v3 = vsel %vm881_vm3, %v865_v52, %v1396_v46 }
 0x11b   :  { %1614 = vrot.lane.b32.xlu2 %v1613_v19, %s1687_s15  ;;  %v1421_v19 = vunpack.i.l.bf16 %v2215_v62 }
 0x11c   :  { %1619 = vrot.lane.b32.xlu0 %v1618_v20, %s1684_s12  ;;  %1609 = vrot.lane.b32.xlu1 %v1608_v28, %s1683_s11 }
 0x11d   :  { %v2247_v21 = vpop.permute.xlu2 %1449 }
 0x11e   :  { %v1400_v22 = vpop.permute.xlu1 %1399  ;;  %v1410_v24 = vpop.permute.xlu0 %1409 }
 0x11f   :  { %v1402_v29 = vunpack.i.h.bf16 %v1400_v22  ;;  %v1401_v33 = vunpack.i.l.bf16 %v1400_v22  ;;  %v1412_v49 = vunpack.i.h.bf16 %v1410_v24  ;;  %v1411_v47 = vunpack.i.l.bf16 %v1410_v24  ;;  %v303_v24 = vld [vmem:[#allocation2 + $0x122] sm:$0xff] }
 0x121   :  { %v2254_v37 = vsel %vm881_vm3, %v868_v18, %v1402_v29  ;;  %v2257_v8 = vsel %vm881_vm3, %v867_v23, %v1401_v33  ;;  %v899_v4 = vsel %vm898_vm4, %v882_v3, %v1411_v47  ;;  %v320_v29 = vld [vmem:[#allocation2 + $0x130] sm:$0xff]  ;;  %v1436_v23 = vunpack.i.l.bf16 %v2234_v11 }
 0x122   :  { %v336_v18 = vld [vmem:[#allocation2 + $0x131] sm:$0xff]  ;;  %v1658_v46 = vpack.i.bf16 %v320_v29, %v271_v48 }
 0x123   :  { %1629 = vrot.lane.b32.xlu2 %v2052_v45, %s1687_s15  ;;  %v866_v45 = vsel %vm149_vm0, %v2071_v53, %v1357_v43  ;;  %v1648_v53 = vpack.i.bf16 %v287_v63, %v2039_v36 }
 0x124   :  { %1634 = vrot.lane.b32.xlu0 %v2142_v27, %s1686_s14  ;;  %1624 = vrot.lane.b32.xlu1 %v1623_v15, %s1686_s14  ;;  %v883_v27 = vsel %vm881_vm3, %v866_v45, %v1397_v56  ;;  %v1653_v56 = vpack.i.bf16 %v303_v24, %v2188_v13  ;;  %v352_v45 = vld [vmem:[#allocation2 + $0x132] sm:$0xff] }
 0x125   :  { %v2266_v51 = vpop.permute.xlu2 %1464  ;;  %v900_v5 = vsel %vm898_vm4, %v883_v27, %v1412_v49  ;;  %v1663_v49 = vpack.i.bf16 %v336_v18, %v287_v63  ;;  %v1668_v48 = vpack.i.bf16 %v352_v45, %v303_v24  ;;  %v216_v63 = vld [vmem:[#allocation2 + $0xa0] sm:$0xff] }
 0x126   :  { %v1415_v55 = vpop.permute.xlu1 %1414  ;;  %v1425_v57 = vpop.permute.xlu0 %1424 }
 0x127   :  { %v1417_v58 = vunpack.i.h.bf16 %v1415_v55  ;;  %v1416_v59 = vunpack.i.l.bf16 %v1415_v55  ;;  %v1427_v32 = vunpack.i.h.bf16 %v1425_v57  ;;  %v1426_v34 = vunpack.i.l.bf16 %v1425_v57 }
 0x129   :  { %v916_v10 = vsel %vm915_vm5, %v899_v4, %v1416_v59  ;;  %v917_v16 = vsel %vm915_vm5, %v900_v5, %v1417_v58  ;;  %v1377_v58 = vunpack.i.h.bf16 %v2175_v38  ;;  %v1376_v59 = vunpack.i.l.bf16 %v2175_v38 }
 0x12a   :  { %v933_v20 = vsel %vm932_vm6, %v916_v10, %v1421_v19  ;;  %v934_v28 = vsel %vm932_vm6, %v917_v16, %v1422_v17  ;;  %v1366_v10 = vunpack.i.l.bf16 %v2205_v50  ;;  %v1407_v17 = vunpack.i.h.bf16 %v2198_v42 }
 0x12b   :  { %1644 = vrot.lane.b32.xlu2 %v1643_v9, %s1682_s10  ;;  %v950_v12 = vsel %vm949_vm7, %v933_v20, %v1426_v34  ;;  %v951_v15 = vsel %vm949_vm7, %v934_v28, %v1427_v32  ;;  %v1367_v9 = vunpack.i.h.bf16 %v2205_v50  ;;  %v874_v16 = vsel %vm149_vm0, %v2099_v0, %v1377_v58 }
 0x12c   :  { %1639 = vrot.lane.b32.xlu1 %v2191_v44, %s1681_s26  ;;  %1649 = vrot.lane.b32.xlu0 %v1648_v53, %s1685_s13  ;;  %v1437_v44 = vunpack.i.h.bf16 %v2234_v11  ;;  %v873_v53 = vsel %vm149_vm0, %v216_v63, %v1376_v59  ;;  %v1406_v38 = vunpack.i.l.bf16 %v2198_v42  ;;  %v869_v0 = vsel %vm149_vm0, %v2139_v26, %v1366_v10 }
 0x12d   :  { %v2287_v62 = vpop.permute.xlu2 %1479  ;;  %v870_v50 = vsel %vm149_vm0, %v2089_v60, %v1367_v9  ;;  %v1467_v26 = vunpack.i.h.bf16 %v2266_v51 }
 0x12e   :  { %v1430_v36 = vpop.permute.xlu1 %1429  ;;  %v1440_v22 = vpop.permute.xlu0 %1439  ;;  %v886_v29 = vsel %vm881_vm3, %v869_v0, %v1406_v38  ;;  %v887_v42 = vsel %vm881_vm3, %v870_v50, %v1407_v17  ;;  %v1481_v10 = vunpack.i.l.bf16 %v2287_v62 }
 0x12f   :  { %v1432_v33 = vunpack.i.h.bf16 %v1430_v36  ;;  %v1431_v35 = vunpack.i.l.bf16 %v1430_v36  ;;  %v1442_v19 = vunpack.i.h.bf16 %v1440_v22  ;;  %v1441_v20 = vunpack.i.l.bf16 %v1440_v22 }
 0x130   :  { %v1452_v22 = vunpack.i.h.bf16 %v2247_v21 }
 0x131   :  { %v967_v40 = vsel %vm966_vm8, %v950_v12, %v1431_v35  ;;  %v968_v43 = vsel %vm966_vm8, %v951_v15, %v1432_v33  ;;  %v1451_v33 = vunpack.i.l.bf16 %v2247_v21  ;;  %v903_v35 = vsel %vm898_vm4, %v886_v29, %v1441_v20 }
 0x132   :  { %v984_v47 = vsel %vm983_vm9, %v967_v40, %v1436_v23  ;;  %v985_v52 = vsel %vm983_vm9, %v968_v43, %v1437_v44  ;;  %v904_v18 = vsel %vm898_vm4, %v887_v42, %v1442_v19  ;;  %v1466_v23 = vunpack.i.l.bf16 %v2266_v51 }
 0x133   :  { %1659 = vrot.lane.b32.xlu2 %v1658_v46, %s1684_s12  ;;  %v1000_v11 = vpack.c.bf16 %v985_v52, %v984_v47  ;;  %v920_v21 = vsel %vm915_vm5, %v903_v35, %v1451_v33 }
 0x134   :  { %1654 = vrot.lane.b32.xlu1 %v1653_v56, %s1683_s11  ;;  %1664 = vrot.lane.b32.xlu0 %v1663_v49, %s1687_s15  ;;  %v921_v49 = vsel %vm915_vm5, %v904_v18, %v1452_v22 }
 0x135   :  { %1323 = vmatmul.msk.bf16.vlgmr.msra.gmra.mxu0 %vm1032_vm10, %v1000_v11  ;;  %v2302_v13 = vpop.permute.xlu2 %1494 }
 0x136   :  { %v1445_v55 = vpop.permute.xlu1 %1444  ;;  %v1455_v57 = vpop.permute.xlu0 %1454 }
 0x137   :  { %v1447_v27 = vunpack.i.h.bf16 %v1445_v55  ;;  %v1446_v3 = vunpack.i.l.bf16 %v1445_v55  ;;  %v1457_v28 = vunpack.i.h.bf16 %v1455_v57  ;;  %v1456_v32 = vunpack.i.l.bf16 %v1455_v57 }
 0x139   :  { %v891_v34 = vsel %vm881_vm3, %v874_v16, %v1447_v27  ;;  %v890_v36 = vsel %vm881_vm3, %v873_v53, %v1446_v3  ;;  %v1497_v16 = vunpack.i.h.bf16 %v2302_v13  ;;  %v1496_v53 = vunpack.i.l.bf16 %v2302_v13 }
 0x13a   :  { %v908_v44 = vsel %vm898_vm4, %v891_v34, %v1457_v28  ;;  %v907_v60 = vsel %vm898_vm4, %v890_v36, %v1456_v32 }
 0x13b   :  { %v924_v47 = vsel %vm915_vm5, %v907_v60, %v1466_v23  ;;  %v925_v52 = vsel %vm915_vm5, %v908_v44, %v1467_v26 }
 0x13c   :  { %1669 = vrot.lane.b32.xlu1 %v1668_v48, %s1686_s14 }
 0x13d   :  { %v2320_v24 = vpop.permute.xlu2 %1509 }
 0x13e   :  { %v1460_v4 = vpop.permute.xlu1 %1459  ;;  %v1470_v5 = vpop.permute.xlu0 %1469 }
 0x13f   :  { %v1462_v12 = vunpack.i.h.bf16 %v1460_v4  ;;  %v1461_v15 = vunpack.i.l.bf16 %v1460_v4  ;;  %v1472_v11 = vunpack.i.h.bf16 %v1470_v5  ;;  %v1471_v55 = vunpack.i.l.bf16 %v1470_v5 }
 0x140   :  { %v1482_v5 = vunpack.i.h.bf16 %v2287_v62 }
 0x141   :  { %v937_v51 = vsel %vm932_vm6, %v920_v21, %v1461_v15  ;;  %v938_v48 = vsel %vm932_vm6, %v921_v49, %v1462_v12  ;;  %v1387_v15 = vunpack.i.h.bf16 %v2236_v7 }
 0x142   :  { %v954_v63 = vsel %vm949_vm7, %v937_v51, %v1471_v55  ;;  %v955_v27 = vsel %vm949_vm7, %v938_v48, %v1472_v11 }
 0x143   :  { %v971_v34 = vsel %vm966_vm8, %v954_v63, %v1481_v10  ;;  %v972_v36 = vsel %vm966_vm8, %v955_v27, %v1482_v5  ;;  %v878_v55 = vsel %vm149_vm0, %v2153_v30, %v1387_v15 }
 0x145   :  { %v1525_v3 = vpop.permute.xlu2 %1524 }
 0x146   :  { %v1475_v40 = vpop.permute.xlu1 %1474  ;;  %v1485_v43 = vpop.permute.xlu0 %1484  ;;  %v1527_v51 = vunpack.i.h.bf16 %v1525_v3  ;;  %v1526_v48 = vunpack.i.l.bf16 %v1525_v3 }
 0x147   :  { %v1477_v56 = vunpack.i.h.bf16 %v1475_v40  ;;  %v1476_v46 = vunpack.i.l.bf16 %v1475_v40  ;;  %v1487_v57 = vunpack.i.h.bf16 %v1485_v43  ;;  %v1486_v45 = vunpack.i.l.bf16 %v1485_v43 }
 0x148   :  { %v1386_v40 = vunpack.i.l.bf16 %v2236_v7  ;;  %v1512_v43 = vunpack.i.h.bf16 %v2320_v24 }
 0x149   :  { %v941_v58 = vsel %vm932_vm6, %v924_v47, %v1476_v46  ;;  %v942_v59 = vsel %vm932_vm6, %v925_v52, %v1477_v56  ;;  %v1511_v56 = vunpack.i.l.bf16 %v2320_v24 }
 0x14a   :  { %v958_v4 = vsel %vm949_vm7, %v941_v58, %v1486_v45  ;;  %v959_v9 = vsel %vm949_vm7, %v942_v59, %v1487_v57  ;;  %v877_v11 = vsel %vm149_vm0, %v2207_v54, %v1386_v40  ;;  %v895_v57 = vsel %vm881_vm3, %v878_v55, %v1512_v43 }
 0x14b   :  { %v975_v50 = vsel %vm966_vm8, %v958_v4, %v1496_v53  ;;  %v976_v0 = vsel %vm966_vm8, %v959_v9, %v1497_v16  ;;  %v894_v7 = vsel %vm881_vm3, %v877_v11, %v1511_v56 }
 0x14d   :  { %v1540_v44 = vpop.permute.xlu2 %1539 }
 0x14e   :  { %v1490_v17 = vpop.permute.xlu1 %1489  ;;  %v1500_v38 = vpop.permute.xlu0 %1499 }
 0x14f   :  { %v1492_v19 = vunpack.i.h.bf16 %v1490_v17  ;;  %v1491_v20 = vunpack.i.l.bf16 %v1490_v17  ;;  %v1502_v28 = vunpack.i.h.bf16 %v1500_v38  ;;  %v1501_v32 = vunpack.i.l.bf16 %v1500_v38 }
 0x151   :  { %v988_v62 = vsel %vm983_vm9, %v971_v34, %v1491_v20  ;;  %v989_v29 = vsel %vm983_vm9, %v972_v36, %v1492_v19  ;;  %v992_v13 = vsel %vm983_vm9, %v975_v50, %v1501_v32  ;;  %v993_v42 = vsel %vm983_vm9, %v976_v0, %v1502_v28 }
 0x152   :  { %v1002_v22 = vpack.c.bf16 %v989_v29, %v988_v62  ;;  %v1004_v33 = vpack.c.bf16 %v993_v42, %v992_v13  ;;  %v1542_v29 = vunpack.i.h.bf16 %v1540_v44  ;;  %v1541_v13 = vunpack.i.l.bf16 %v1540_v44 }
 0x154   :  { %1325 = vmatmul.msk.bf16.vlgmr.msra.gmra.mxu1 %vm1032_vm10, %v1002_v22  ;;  %1327 = vmatmul.msk.bf16.vlgmr.msra.gmra.mxu2 %vm1032_vm10, %v1004_v33 }
 0x155   :  { %v1555_v46 = vpop.permute.xlu2 %1554 }
 0x156   :  { %v1505_v35 = vpop.permute.xlu1 %1504  ;;  %v1515_v18 = vpop.permute.xlu0 %1514  ;;  %v1557_v9 = vunpack.i.h.bf16 %v1555_v46  ;;  %v1556_v30 = vunpack.i.l.bf16 %v1555_v46 }
 0x157   :  { %v1507_v60 = vunpack.i.h.bf16 %v1505_v35  ;;  %v1506_v26 = vunpack.i.l.bf16 %v1505_v35  ;;  %v1517_v21 = vunpack.i.h.bf16 %v1515_v18  ;;  %v1516_v49 = vunpack.i.l.bf16 %v1515_v18 }
 0x159   :  { %v901_v47 = vsel %vm898_vm4, %v2257_v8, %v1506_v26  ;;  %v902_v52 = vsel %vm898_vm4, %v2254_v37, %v1507_v60 }
 0x15a   :  { %v919_v24 = vsel %vm915_vm5, %v902_v52, %v1517_v21  ;;  %v918_v45 = vsel %vm915_vm5, %v901_v47, %v1516_v49 }
 0x15b   :  { %v935_v5 = vsel %vm932_vm6, %v918_v45, %v1526_v48  ;;  %v936_v10 = vsel %vm932_vm6, %v919_v24, %v1527_v51  ;;  %v1372_v24 = vunpack.i.h.bf16 %v2220_v25  ;;  %v1371_v45 = vunpack.i.l.bf16 %v2220_v25 }
 0x15c   :  { %v1382_v51 = vunpack.i.h.bf16 %v2222_v2  ;;  %v1381_v48 = vunpack.i.l.bf16 %v2222_v2 }
 0x15d   :  { %v1570_v32 = vpop.permute.xlu2 %1569 }
 0x15e   :  { %v1520_v23 = vpop.permute.xlu1 %1519  ;;  %v1530_v12 = vpop.permute.xlu0 %1529  ;;  %v1571_v15 = vunpack.i.l.bf16 %v1570_v32  ;;  %v875_v25 = vsel %vm149_vm0, %v2101_v1, %v1381_v48 }
 0x15f   :  { %v1522_v8 = vunpack.i.h.bf16 %v1520_v23  ;;  %v1521_v58 = vunpack.i.l.bf16 %v1520_v23  ;;  %v1532_v16 = vunpack.i.h.bf16 %v1530_v12  ;;  %v1531_v53 = vunpack.i.l.bf16 %v1530_v12 }
 0x160   :  { %v1572_v12 = vunpack.i.h.bf16 %v1570_v32 }
 0x161   :  { %v911_v38 = vsel %vm898_vm4, %v894_v7, %v1521_v58  ;;  %v912_v19 = vsel %vm898_vm4, %v895_v57, %v1522_v8 }
 0x162   :  { %v929_v0 = vsel %vm915_vm5, %v912_v19, %v1532_v16  ;;  %v928_v62 = vsel %vm915_vm5, %v911_v38, %v1531_v53 }
 0x163   :  { %v945_v26 = vsel %vm932_vm6, %v928_v62, %v1541_v13  ;;  %v946_v23 = vsel %vm932_vm6, %v929_v0, %v1542_v29 }
 0x165   :  { %v1585_v47 = vpop.permute.xlu2 %1584 }
 0x166   :  { %v1535_v59 = vpop.permute.xlu1 %1534  ;;  %v1545_v37 = vpop.permute.xlu0 %1544  ;;  %v1586_v38 = vunpack.i.l.bf16 %v1585_v47 }
 0x167   :  { %v1537_v63 = vunpack.i.h.bf16 %v1535_v59  ;;  %v1536_v27 = vunpack.i.l.bf16 %v1535_v59  ;;  %v1547_v54 = vunpack.i.h.bf16 %v1545_v37  ;;  %v1546_v4 = vunpack.i.l.bf16 %v1545_v37 }
 0x169   :  { %v952_v17 = vsel %vm949_vm7, %v935_v5, %v1536_v27  ;;  %v953_v3 = vsel %vm949_vm7, %v936_v10, %v1537_v63 }
 0x16a   :  { %v969_v20 = vsel %vm966_vm8, %v952_v17, %v1546_v4  ;;  %v970_v28 = vsel %vm966_vm8, %v953_v3, %v1547_v54  ;;  %v871_v54 = vsel %vm149_vm0, %v2091_v61, %v1371_v45  ;;  %v872_v4 = vsel %vm149_vm0, %v2110_v6, %v1372_v24 }
 0x16b   :  { %v986_v34 = vsel %vm983_vm9, %v969_v20, %v1556_v30  ;;  %v987_v36 = vsel %vm983_vm9, %v970_v28, %v1557_v9  ;;  %v876_v9 = vsel %vm149_vm0, %v2119_v14, %v1382_v51  ;;  %v1587_v6 = vunpack.i.h.bf16 %v1585_v47 }
 0x16c   :  { %v1001_v50 = vpack.c.bf16 %v987_v36, %v986_v34 }
 0x16d   :  { %v1600_v57 = vpop.permute.xlu2 %1599 }
 0x16e   :  { %v1550_v42 = vpop.permute.xlu1 %1549  ;;  %v1560_v22 = vpop.permute.xlu0 %1559  ;;  %1324 = vmatmul.msk.bf16.gmra.mxu0 %vm1032_vm10, %v1001_v50  ;;  %v1602_v28 = vunpack.i.h.bf16 %v1600_v57  ;;  %v1601_v32 = vunpack.i.l.bf16 %v1600_v57 }
 0x16f   :  { %v1552_v33 = vunpack.i.h.bf16 %v1550_v42  ;;  %v1551_v35 = vunpack.i.l.bf16 %v1550_v42  ;;  %v1562_v18 = vunpack.i.h.bf16 %v1560_v22  ;;  %v1561_v60 = vunpack.i.l.bf16 %v1560_v22 }
 0x171   :  { %v962_v40 = vsel %vm949_vm7, %v945_v26, %v1551_v35  ;;  %v963_v43 = vsel %vm949_vm7, %v946_v23, %v1552_v33 }
 0x172   :  { %v979_v44 = vsel %vm966_vm8, %v962_v40, %v1561_v60  ;;  %v980_v56 = vsel %vm966_vm8, %v963_v43, %v1562_v18 }
 0x173   :  { %v996_v46 = vsel %vm983_vm9, %v979_v44, %v1571_v15  ;;  %v997_v21 = vsel %vm983_vm9, %v980_v56, %v1572_v12 }
 0x174   :  { %v1006_v49 = vpack.c.bf16 %v997_v21, %v996_v46 }
 0x175   :  { %v1615_v30 = vpop.permute.xlu2 %1614 }
 0x176   :  { %v1565_v52 = vpop.permute.xlu1 %1564  ;;  %v1575_v11 = vpop.permute.xlu0 %1574  ;;  %1329 = vmatmul.msk.bf16.vlgmr.msra.gmra.mxu3 %vm1032_vm10, %v1006_v49  ;;  %v1617_v49 = vunpack.i.h.bf16 %v1615_v30  ;;  %v1616_v47 = vunpack.i.l.bf16 %v1615_v30  ;;  %v1391_v30 = vunpack.i.l.bf16 %v2186_v41 }
 0x177   :  { %v1567_v8 = vunpack.i.h.bf16 %v1565_v52  ;;  %v1566_v58 = vunpack.i.l.bf16 %v1565_v52  ;;  %v1577_v2 = vunpack.i.h.bf16 %v1575_v11  ;;  %v1576_v5 = vunpack.i.l.bf16 %v1575_v11 }
 0x179   :  { %v889_v53 = vsel %vm881_vm3, %v872_v4, %v1567_v8  ;;  %v888_v17 = vsel %vm881_vm3, %v871_v54, %v1566_v58 }
 0x17a   :  { %v906_v14 = vsel %vm898_vm4, %v889_v53, %v1577_v2  ;;  %v905_v19 = vsel %vm898_vm4, %v888_v17, %v1576_v5 }
 0x17b   :  { %v922_v13 = vsel %vm915_vm5, %v905_v19, %v1586_v38  ;;  %v923_v42 = vsel %vm915_vm5, %v906_v14, %v1587_v6 }
 0x17d   :  { %v1630_v43 = vpop.permute.xlu2 %1629 }
 0x17e   :  { %v1580_v55 = vpop.permute.xlu1 %1579  ;;  %v1590_v7 = vpop.permute.xlu0 %1589  ;;  %v1632_v52 = vunpack.i.h.bf16 %v1630_v43  ;;  %v1631_v11 = vunpack.i.l.bf16 %v1630_v43 }
 0x17f   :  { %v1582_v59 = vunpack.i.h.bf16 %v1580_v55  ;;  %v1581_v37 = vunpack.i.l.bf16 %v1580_v55  ;;  %v1592_v10 = vunpack.i.h.bf16 %v1590_v7  ;;  %v1591_v16 = vunpack.i.l.bf16 %v1590_v7 }
 0x181   :  { %v892_v61 = vsel %vm881_vm3, %v875_v25, %v1581_v37  ;;  %v893_v3 = vsel %vm881_vm3, %v876_v9, %v1582_v59  ;;  %v1392_v25 = vunpack.i.h.bf16 %v2186_v41 }
 0x182   :  { %v909_v1 = vsel %vm898_vm4, %v892_v61, %v1591_v16  ;;  %v910_v20 = vsel %vm898_vm4, %v893_v3, %v1592_v10  ;;  %v879_v61 = vsel %vm149_vm0, %v2155_v31, %v1391_v30 }
 0x183   :  { %v926_v22 = vsel %vm915_vm5, %v909_v1, %v1601_v32  ;;  %v927_v33 = vsel %vm915_vm5, %v910_v20, %v1602_v28  ;;  %v880_v17 = vsel %vm149_vm0, %v2177_v39, %v1392_v25 }
 0x185   :  { %v1645_v2 = vpop.permute.xlu2 %1644 }
 0x186   :  { %v1595_v63 = vpop.permute.xlu1 %1594  ;;  %v1605_v27 = vpop.permute.xlu0 %1604  ;;  %v1647_v38 = vunpack.i.h.bf16 %v1645_v2  ;;  %v1646_v14 = vunpack.i.l.bf16 %v1645_v2 }
 0x187   :  { %v1597_v34 = vunpack.i.h.bf16 %v1595_v63  ;;  %v1596_v36 = vunpack.i.l.bf16 %v1595_v63  ;;  %v1607_v35 = vunpack.i.h.bf16 %v1605_v27  ;;  %v1606_v18 = vunpack.i.l.bf16 %v1605_v27 }
 0x189   :  { %v939_v23 = vsel %vm932_vm6, %v922_v13, %v1596_v36  ;;  %v940_v12 = vsel %vm932_vm6, %v923_v42, %v1597_v34 }
 0x18a   :  { %v956_v44 = vsel %vm949_vm7, %v939_v23, %v1606_v18  ;;  %v957_v56 = vsel %vm949_vm7, %v940_v12, %v1607_v35 }
 0x18b   :  { %v973_v48 = vsel %vm966_vm8, %v956_v44, %v1616_v47  ;;  %v974_v8 = vsel %vm966_vm8, %v957_v56, %v1617_v49  ;;  %v1673_v49 = vld [vmem:[%s2669_s2] ss:$0 sm:$0xff] }
 0x18d   :  { %v1660_v36 = vpop.permute.xlu2 %1659 }
 0x18e   :  { %v1610_v50 = vpop.permute.xlu1 %1609  ;;  %v1620_v0 = vpop.permute.xlu0 %1619 }
 0x18f   :  { %v1612_v62 = vunpack.i.h.bf16 %v1610_v50  ;;  %v1611_v29 = vunpack.i.l.bf16 %v1610_v50  ;;  %v1622_v60 = vunpack.i.h.bf16 %v1620_v0  ;;  %v1621_v26 = vunpack.i.l.bf16 %v1620_v0 }
 0x191   :  { %v943_v15 = vsel %vm932_vm6, %v926_v22, %v1611_v29  ;;  %v944_v40 = vsel %vm932_vm6, %v927_v33, %v1612_v62  ;;  %v1662_v62 = vunpack.i.h.bf16 %v1660_v36  ;;  %v1661_v29 = vunpack.i.l.bf16 %v1660_v36 }
 0x192   :  { %v960_v46 = vsel %vm949_vm7, %v943_v15, %v1621_v26  ;;  %v961_v21 = vsel %vm949_vm7, %v944_v40, %v1622_v60 }
 0x193   :  { %v977_v58 = vsel %vm966_vm8, %v960_v46, %v1631_v11  ;;  %v978_v59 = vsel %vm966_vm8, %v961_v21, %v1632_v52 }
 0x196   :  { %v1625_v55 = vpop.permute.xlu1 %1624  ;;  %v1635_v7 = vpop.permute.xlu0 %1634 }
 0x197   :  { %v1627_v57 = vunpack.i.h.bf16 %v1625_v55  ;;  %v1626_v24 = vunpack.i.l.bf16 %v1625_v55  ;;  %v1637_v45 = vunpack.i.h.bf16 %v1635_v7  ;;  %v1636_v51 = vunpack.i.l.bf16 %v1635_v7 }
 0x199   :  { %v990_v37 = vsel %vm983_vm9, %v973_v48, %v1626_v24  ;;  %v991_v63 = vsel %vm983_vm9, %v974_v8, %v1627_v57  ;;  %v994_v27 = vsel %vm983_vm9, %v977_v58, %v1636_v51  ;;  %v995_v54 = vsel %vm983_vm9, %v978_v59, %v1637_v45 }
 0x19a   :  { %v1003_v4 = vpack.c.bf16 %v991_v63, %v990_v37  ;;  %v1005_v9 = vpack.c.bf16 %v995_v54, %v994_v27 }
 0x19c   :  { %1326 = vmatmul.msk.bf16.gmra.mxu1 %vm1032_vm10, %v1003_v4  ;;  %1328 = vmatmul.msk.bf16.gmra.mxu2 %vm1032_vm10, %v1005_v9 }
 0x19e   :  { %v1640_v5 = vpop.permute.xlu1 %1639  ;;  %v1650_v53 = vpop.permute.xlu0 %1649 }
 0x19f   :  { %v1642_v10 = vunpack.i.h.bf16 %v1640_v5  ;;  %v1641_v16 = vunpack.i.l.bf16 %v1640_v5  ;;  %v1652_v20 = vunpack.i.h.bf16 %v1650_v53  ;;  %v1651_v28 = vunpack.i.l.bf16 %v1650_v53 }
 0x1a1   :  { %v897_v3 = vsel %vm881_vm3, %v880_v17, %v1642_v10  ;;  %v896_v6 = vsel %vm881_vm3, %v879_v61, %v1641_v16 }
 0x1a2   :  { %v913_v19 = vsel %vm898_vm4, %v896_v6, %v1646_v14  ;;  %v914_v41 = vsel %vm898_vm4, %v897_v3, %v1647_v38 }
 0x1a3   :  { %v931_v39 = vsel %vm915_vm5, %v914_v41, %v1652_v20  ;;  %v930_v31 = vsel %vm915_vm5, %v913_v19, %v1651_v28 }
 0x1a6   :  { %v1655_v1 = vpop.permute.xlu1 %1654  ;;  %v1665_v13 = vpop.permute.xlu0 %1664 }
 0x1a7   :  { %v1657_v32 = vunpack.i.h.bf16 %v1655_v1  ;;  %v1656_v34 = vunpack.i.l.bf16 %v1655_v1  ;;  %v1667_v33 = vunpack.i.h.bf16 %v1665_v13  ;;  %v1666_v35 = vunpack.i.l.bf16 %v1665_v13 }
 0x1a9   :  { %v947_v50 = vsel %vm932_vm6, %v930_v31, %v1656_v34  ;;  %v948_v0 = vsel %vm932_vm6, %v931_v39, %v1657_v32 }
 0x1aa   :  { %v964_v42 = vsel %vm949_vm7, %v947_v50, %v1661_v29  ;;  %v965_v22 = vsel %vm949_vm7, %v948_v0, %v1662_v62  ;;  %v1688_v0 = vmov 128.0  }
 0x1ab   :  { %v981_v23 = vsel %vm966_vm8, %v964_v42, %v1666_v35  ;;  %v982_v12 = vsel %vm966_vm8, %v965_v22, %v1667_v33  ;;  %1674 = vrcp.f32 %v1688_v0 }
 0x1ae   :  { %v1670_v18 = vpop.permute.xlu1 %1669 }
 0x1af   :  { %v1672_v60 = vunpack.i.h.bf16 %v1670_v18  ;;  %v1671_v26 = vunpack.i.l.bf16 %v1670_v18 }
 0x1b1   :  { %v998_v15 = vsel %vm983_vm9, %v981_v23, %v1671_v26  ;;  %v999_v40 = vsel %vm983_vm9, %v982_v12, %v1672_v60  ;;  %v1675_v18 = vpop.eup %1674 }
 0x1b2   :  { %v1007_v43 = vpack.c.bf16 %v999_v40, %v998_v15  ;;  %v1070_v44 = vpop.f32.mrf.mxu0  ;;  %v1148_v12 = vmul.f32 128.0, %v1675_v18  ;;  %vm1152_vm11 = vweird.f32 %v1675_v18 }
 0x1b3   :  { %v2464_v55 = vadd.f32 %v1673_v49, %v1070_v44 }
 0x1b4   :  { %1330 = vmatmul.msk.bf16.gmra.mxu3 %vm1032_vm10, %v1007_v43 }
 0x1b5   :  { %v1110_v51 = vsel %vm881_vm3, %v2464_v55, 0.0 }
 0x1ba   :  { %v1072_v56 = vpop.f32.mrf.mxu0 }
 0x1bb   :  { %v2462_v47 = vadd.f32 %v1673_v49, %v1072_v56 }
 0x1bd   :  { %v1111_v24 = vsel %vm881_vm3, %v2462_v47, 0.0 }
 0x1be   :  { %v1112_v8 = vadd.f32 %v1111_v24, %v1110_v51 }
 0x1d1   :  { %v1080_v46 = vpop.f32.mrf.mxu1 }
 0x1d2   :  { %v2478_v63 = vadd.f32 %v1673_v49, %v1080_v46  ;;  %v1149_v46 = vsub.f32 1.0, %v1148_v12 }
 0x1d4   :  { %v1117_v4 = vsel %vm881_vm3, %v2478_v63, 0.0 }
 0x1d7   :  { %v1090_v57 = vpop.f32.mrf.mxu2 }
 0x1d8   :  { %v2494_v38 = vadd.f32 %v1673_v49, %v1090_v57 }
 0x1d9   :  { %v1082_v52 = vpop.f32.mrf.mxu1 }
 0x1da   :  { %v2482_v9 = vadd.f32 %v1673_v49, %v1082_v52  ;;  %v1125_v19 = vsel %vm881_vm3, %v2494_v38, 0.0 }
 0x1dc   :  { %v1119_v5 = vsel %vm881_vm3, %v2482_v9, 0.0 }
 0x1df   :  { %v1092_v54 = vpop.f32.mrf.mxu2 }
 0x1e0   :  { %v2498_v41 = vadd.f32 %v1673_v49, %v1092_v54 }
 0x1e2   :  { %v1127_v20 = vsel %vm881_vm3, %v2498_v41, 0.0 }
 0x1eb   :  { %v1075_v21 = vpop.f32.mrf.mxu0 }
 0x1ec   :  { %v2466_v7 = vadd.f32 %v1673_v49, %v1075_v21 }
 0x1ee   :  { %v1113_v48 = vsel %vm881_vm3, %v2466_v7, 0.0 }
 0x1ef   :  { %v1114_v59 = vadd.f32 %v1113_v48, %v1112_v8 }
 0x1f3   :  { %v1077_v11 = vpop.f32.mrf.mxu0 }
 0x1f4   :  { %v2470_v45 = vadd.f32 %v1673_v49, %v1077_v11  ;;  %v1150_v11 = vmul.f32 %v1675_v18, %v1149_v46 }
 0x1f6   :  { %v1115_v58 = vsel %vm881_vm3, %v2470_v45, 0.0  ;;  %v1151_v51 = vadd.f32 %v1675_v18, %v1150_v11 }
 0x1f7   :  { %v1116_v27 = vadd.f32 %v1115_v58, %v1114_v59 }
 0x1f8   :  { %v2526_v58 = vsel %vm1152_vm11, %v1675_v18, %v1151_v51 }
 0x1f9   :  { %v1118_v30 = vadd.f32 %v1117_v4, %v1116_v27  ;;  %v1100_v61 = vpop.f32.mrf.mxu3 }
 0x1fa   :  { %v2508_v62 = vadd.f32 %v1673_v49, %v1100_v61 }
 0x1fb   :  { %v1120_v53 = vadd.f32 %v1119_v5, %v1118_v30 }
 0x1fc   :  { %v1133_v22 = vsel %vm881_vm3, %v2508_v62, 0.0 }
 0x201   :  { %v1102_v32 = vpop.f32.mrf.mxu3 }
 0x202   :  { %v2514_v33 = vadd.f32 %v1673_v49, %v1102_v32 }
 0x204   :  { %v1135_v26 = vsel %vm881_vm3, %v2514_v33, 0.0 }
 0x219   :  { %v1085_v37 = vpop.f32.mrf.mxu1 }
 0x21a   :  { %v2484_v25 = vadd.f32 %v1673_v49, %v1085_v37 }
 0x21c   :  { %v1121_v10 = vsel %vm881_vm3, %v2484_v25, 0.0 }
 0x21d   :  { %v1122_v3 = vadd.f32 %v1121_v10, %v1120_v53 }
 0x21f   :  { %v1095_v6 = vpop.f32.mrf.mxu2 }
 0x220   :  { %v2502_v28 = vadd.f32 %v1673_v49, %v1095_v6 }
 0x221   :  { %v1087_v2 = vpop.f32.mrf.mxu1 }
 0x222   :  { %v2490_v16 = vadd.f32 %v1673_v49, %v1087_v2  ;;  %v1129_v39 = vsel %vm881_vm3, %v2502_v28, 0.0 }
 0x224   :  { %v1123_v17 = vsel %vm881_vm3, %v2490_v16, 0.0 }
 0x225   :  { %v1124_v14 = vadd.f32 %v1123_v17, %v1122_v3 }
 0x227   :  { %v1126_v1 = vadd.f32 %v1125_v19, %v1124_v14  ;;  %v1097_v34 = vpop.f32.mrf.mxu2 }
 0x228   :  { %v2506_v31 = vadd.f32 %v1673_v49, %v1097_v34 }
 0x229   :  { %v1128_v36 = vadd.f32 %v1127_v20, %v1126_v1 }
 0x22a   :  { %v1131_v29 = vsel %vm881_vm3, %v2506_v31, 0.0 }
 0x22b   :  { %v1130_v50 = vadd.f32 %v1129_v39, %v1128_v36 }
 0x22d   :  { %v1132_v13 = vadd.f32 %v1131_v29, %v1130_v50 }
 0x22f   :  { %v1134_v60 = vadd.f32 %v1133_v22, %v1132_v13 }
 0x231   :  { %v1136_v15 = vadd.f32 %v1135_v26, %v1134_v60 }
 0x237   :  { %v1105_v42 = vpop.f32.mrf.mxu3 }
 0x238   :  { %v2516_v35 = vadd.f32 %v1673_v49, %v1105_v42 }
 0x23a   :  { %v1137_v23 = vsel %vm881_vm3, %v2516_v35, 0.0 }
 0x23b   :  { %v1138_v44 = vadd.f32 %v1137_v23, %v1136_v15 }
 0x23f   :  { %v1107_v40 = vpop.f32.mrf.mxu3 }
 0x240   :  { %v2522_v43 = vadd.f32 %v1673_v49, %v1107_v40 }
 0x242   :  { %v1139_v56 = vsel %vm881_vm3, %v2522_v43, 0.0 }
 0x243   :  { %v1140_v21 = vadd.f32 %v1139_v56, %v1138_v44 }
 0x245   :  { %v1141_v52 = vrot.slane %v1140_v21, 4 }
 0x247   :  { %v1142_v57 = vadd.f32 %v1141_v52, %v1140_v21 }
 0x249   :  { %v1143_v24 = vrot.slane %v1142_v57, 2 }
 0x24b   :  { %v1144_v48 = vadd.f32 %v1143_v24, %v1142_v57 }
 0x24d   :  { %v1145_v8 = vrot.slane %v1144_v48, 1 }
 0x24f   :  { %v1146_v59 = vadd.f32 %v1145_v8, %v1144_v48 }
 0x251   :  { %v2529_v49 = vmul.f32 %v2526_v58, %v1146_v59 }
 0x253   :  { %v1155_v37 = vsub.f32 %v2464_v55, %v2529_v49  ;;  %v1156_v27 = vsub.f32 %v2462_v47, %v2529_v49  ;;  %v1157_v54 = vsub.f32 %v2466_v7, %v2529_v49  ;;  %v1158_v4 = vsub.f32 %v2470_v45, %v2529_v49 }
 0x254   :  { %v1159_v5 = vsub.f32 %v2478_v63, %v2529_v49  ;;  %v1160_v53 = vsub.f32 %v2482_v9, %v2529_v49  ;;  %v1161_v14 = vsub.f32 %v2484_v25, %v2529_v49  ;;  %v1162_v32 = vsub.f32 %v2490_v16, %v2529_v49 }
 0x255   :  { %v1171_v30 = vmul.f32 %v1155_v37, %v1155_v37  ;;  %v1172_v2 = vmul.f32 %v1156_v27, %v1156_v27  ;;  %v1173_v10 = vmul.f32 %v1157_v54, %v1157_v54  ;;  %v1174_v17 = vmul.f32 %v1158_v4, %v1158_v4 }
 0x256   :  { %v1175_v19 = vmul.f32 %v1159_v5, %v1159_v5  ;;  %v1176_v34 = vmul.f32 %v1160_v53, %v1160_v53  ;;  %v1163_v50 = vsub.f32 %v2494_v38, %v2529_v49  ;;  %v1177_v0 = vmul.f32 %v1161_v14, %v1161_v14 }
 0x257   :  { %v1187_v61 = vsel %vm881_vm3, %v1171_v30, 0.0  ;;  %v1188_v3 = vsel %vm881_vm3, %v1172_v2, 0.0  ;;  %v1190_v1 = vsel %vm881_vm3, %v1173_v10, 0.0  ;;  %v1192_v36 = vsel %vm881_vm3, %v1174_v17, 0.0 }
 0x258   :  { %v1189_v6 = vadd.f32 %v1188_v3, %v1187_v61  ;;  %v1194_v29 = vsel %vm881_vm3, %v1175_v19, 0.0  ;;  %v1164_v42 = vsub.f32 %v2498_v41, %v2529_v49  ;;  %v1178_v22 = vmul.f32 %v1162_v32, %v1162_v32 }
 0x259   :  { %v1196_v18 = vsel %vm881_vm3, %v1176_v34, 0.0  ;;  %v1165_v26 = vsub.f32 %v2502_v28, %v2529_v49  ;;  %v1179_v23 = vmul.f32 %v1163_v50, %v1163_v50  ;;  %v1198_v12 = vsel %vm881_vm3, %v1177_v0, 0.0 }
 0x25a   :  { %v1191_v20 = vadd.f32 %v1190_v1, %v1189_v6  ;;  %v1166_v40 = vsub.f32 %v2506_v31, %v2529_v49  ;;  %v1180_v44 = vmul.f32 %v1164_v42, %v1164_v42  ;;  %v1200_v56 = vsel %vm881_vm3, %v1178_v22, 0.0 }
 0x25b   :  { %v1167_v21 = vsub.f32 %v2508_v62, %v2529_v49  ;;  %v1181_v52 = vmul.f32 %v1165_v26, %v1165_v26  ;;  %v1202_v11 = vsel %vm881_vm3, %v1179_v23, 0.0  ;;  %v1168_v24 = vsub.f32 %v2514_v33, %v2529_v49  ;;  %v1225_v23 = vld [vmem:[%s2670_s3] sm:$0x1] }
 0x25c   :  { %v1193_v39 = vadd.f32 %v1192_v36, %v1191_v20  ;;  %v1182_v51 = vmul.f32 %v1166_v40, %v1166_v40  ;;  %v1204_v48 = vsel %vm881_vm3, %v1180_v44, 0.0  ;;  %v1169_v59 = vsub.f32 %v2516_v35, %v2529_v49 }
 0x25d   :  { %v1183_v37 = vmul.f32 %v1167_v21, %v1167_v21  ;;  %v1206_v27 = vsel %vm881_vm3, %v1181_v52, 0.0  ;;  %v1170_v4 = vsub.f32 %v2522_v43, %v2529_v49  ;;  %v1184_v30 = vmul.f32 %v1168_v24, %v1168_v24 }
 0x25e   :  { %v1195_v13 = vadd.f32 %v1194_v29, %v1193_v39  ;;  %v1208_v2 = vsel %vm881_vm3, %v1182_v51, 0.0  ;;  %v1185_v10 = vmul.f32 %v1169_v59, %v1169_v59 }
 0x25f   :  { %v1210_v53 = vsel %vm881_vm3, %v1183_v37, 0.0  ;;  %v1186_v61 = vmul.f32 %v1170_v4, %v1170_v4  ;;  %v1212_v3 = vsel %vm881_vm3, %v1184_v30, 0.0 }
 0x260   :  { %v1197_v60 = vadd.f32 %v1196_v18, %v1195_v13  ;;  %v1214_v14 = vsel %vm881_vm3, %v1185_v10, 0.0 }
 0x261   :  { %v1216_v1 = vsel %vm881_vm3, %v1186_v61, 0.0 }
 0x262   :  { %v1199_v15 = vadd.f32 %v1198_v12, %v1197_v60 }
 0x264   :  { %v1201_v46 = vadd.f32 %v1200_v56, %v1199_v15 }
 0x266   :  { %v1203_v57 = vadd.f32 %v1202_v11, %v1201_v46 }
 0x268   :  { %v1205_v8 = vadd.f32 %v1204_v48, %v1203_v57 }
 0x26a   :  { %v1207_v54 = vadd.f32 %v1206_v27, %v1205_v8 }
 0x26c   :  { %v1209_v5 = vadd.f32 %v1208_v2, %v1207_v54 }
 0x26e   :  { %v1211_v17 = vadd.f32 %v1210_v53, %v1209_v5 }
 0x270   :  { %v1213_v6 = vadd.f32 %v1212_v3, %v1211_v17 }
 0x272   :  { %v1215_v19 = vadd.f32 %v1214_v14, %v1213_v6 }
 0x274   :  { %v1217_v20 = vadd.f32 %v1216_v1, %v1215_v19 }
 0x276   :  { %v1218_v32 = vrot.slane %v1217_v20, 4 }
 0x278   :  { %v1219_v34 = vadd.f32 %v1218_v32, %v1217_v20 }
 0x27a   :  { %v1220_v36 = vrot.slane %v1219_v34, 2 }
 0x27c   :  { %v1221_v39 = vadd.f32 %v1220_v36, %v1219_v34 }
 0x27e   :  { %v1222_v50 = vrot.slane %v1221_v39, 1 }
 0x280   :  { %v1223_v0 = vadd.f32 %v1222_v50, %v1221_v39 }
 0x282   :  { %v1224_v29 = vmul.f32 %v1223_v0, %v2526_v58  ;;  %v1238_v58 = vld [vmem:[%s2671_s4] sm:$0x1] }
 0x284   :  { %v1226_v13 = vadd.f32 1e-05, %v1224_v29 }
 0x286   :  { %1676 = vrsqrt.f32 %v1226_v13  ;;  %vm1233_vm13 = vweird.f32 %v1226_v13 }
 0x28c   :  { %v1677_v42 = vpop.eup %1676 }
 0x28d   :  { %v1228_v22 = vmul.f32 %v1677_v42, %v1226_v13  ;;  %vm1234_vm12 = vweird.f32 %v1677_v42 }
 0x28e   :  { %vm1235_vm14 = vmor %vm1233_vm13, %vm1234_vm12 }
 0x28f   :  { %v1229_v18 = vmul.f32 %v1677_v42, %v1228_v22 }
 0x291   :  { %v1230_v60 = vmul.f32 0.5, %v1229_v18 }
 0x293   :  { %v1231_v26 = vsub.f32 1.5, %v1230_v60 }
 0x295   :  { %v1232_v12 = vmul.f32 %v1677_v42, %v1231_v26 }
 0x297   :  { %v1236_v15 = vsel %vm1235_vm14, %v1677_v42, %v1232_v12 }
 0x298   :  { %v1237_v40 = vmul.f32 %v1236_v15, %v1225_v23 }
 0x29a   :  { %v1239_v44 = vmul.f32 %v1237_v40, %v2529_v49  ;;  %v1242_v46 = vperm.slane %v1237_v40, 0 }
 0x29c   :  { %v1240_v56 = vsub.f32 %v1238_v58, %v1239_v44  ;;  %v1244_v21 = vmul.f32 %v1242_v46, %v2464_v55  ;;  %v1245_v52 = vmul.f32 %v1242_v46, %v2462_v47  ;;  %v1246_v11 = vmul.f32 %v1242_v46, %v2466_v7 }
 0x29d   :  { %v1247_v24 = vmul.f32 %v1242_v46, %v2470_v45  ;;  %v1248_v51 = vmul.f32 %v1242_v46, %v2478_v63  ;;  %v1249_v37 = vmul.f32 %v1242_v46, %v2482_v9  ;;  %v1250_v49 = vmul.f32 %v1242_v46, %v2484_v25 }
 0x29e   :  { %v1261_v57 = vperm.slane %v1240_v56, 0  ;;  %v1251_v55 = vmul.f32 %v1242_v46, %v2490_v16  ;;  %v1252_v47 = vmul.f32 %v1242_v46, %v2494_v38  ;;  %v1253_v63 = vmul.f32 %v1242_v46, %v2498_v41 }
 0x29f   :  { %v1254_v53 = vmul.f32 %v1242_v46, %v2502_v28  ;;  %v1255_v25 = vmul.f32 %v1242_v46, %v2506_v31  ;;  %v1256_v41 = vmul.f32 %v1242_v46, %v2508_v62  ;;  %v1257_v3 = vmul.f32 %v1242_v46, %v2514_v33 }
 0x2a0   :  { %v1263_v48 = vadd.f32 %v1261_v57, %v1244_v21  ;;  %v1264_v8 = vadd.f32 %v1261_v57, %v1245_v52  ;;  %v1265_v59 = vadd.f32 %v1261_v57, %v1246_v11  ;;  %v1266_v27 = vadd.f32 %v1261_v57, %v1247_v24 }
 0x2a1   :  { %v1267_v54 = vadd.f32 %v1261_v57, %v1248_v51  ;;  %v1268_v4 = vadd.f32 %v1261_v57, %v1249_v37  ;;  %v1269_v7 = vadd.f32 %v1261_v57, %v1250_v49  ;;  %v1270_v5 = vadd.f32 %v1261_v57, %v1251_v55 }
 0x2a2   :  { %v1279_v30 = vmax.f32 %v1263_v48, 0.0  ;;  %v1280_v2 = vmax.f32 %v1264_v8, 0.0  ;;  %v1281_v45 = vmax.f32 %v1265_v59, 0.0  ;;  %v1282_v10 = vmax.f32 %v1266_v27, 0.0 }
 0x2a3   :  { %v1271_v9 = vadd.f32 %v1261_v57, %v1252_v47  ;;  %v1283_v17 = vmax.f32 %v1267_v54, 0.0  ;;  %v1272_v16 = vadd.f32 %v1261_v57, %v1253_v63  ;;  %v1284_v38 = vmax.f32 %v1268_v4, 0.0 }
 0x2a4   :  { %1295 = vst.msk [vmem:[%s2672_s5] sm:$0xff] %vm881_vm3, %v1279_v30  ;;  %v1273_v61 = vadd.f32 %v1261_v57, %v1254_v53  ;;  %v1285_v28 = vmax.f32 %v1269_v7, 0.0  ;;  %v1274_v6 = vadd.f32 %v1261_v57, %v1255_v25  ;;  %v1286_v31 = vmax.f32 %v1270_v5, 0.0 }
 0x2a5   :  { %1296 = vst.msk [vmem:[%s2672_s5 + $0x8] sm:$0xff] %vm881_vm3, %v1280_v2  ;;  %v1258_v14 = vmul.f32 %v1242_v46, %v2516_v35  ;;  %v1275_v19 = vadd.f32 %v1261_v57, %v1256_v41  ;;  %v1287_v62 = vmax.f32 %v1271_v9, 0.0  ;;  %v1259_v1 = vmul.f32 %v1242_v46, %v2522_v43 }
 0x2a6   :  { %1297 = vst.msk [vmem:[%s2672_s5 + $0x10] sm:$0xff] %vm881_vm3, %v1281_v45  ;;  %v1276_v20 = vadd.f32 %v1261_v57, %v1257_v3  ;;  %v1288_v33 = vmax.f32 %v1272_v16, 0.0  ;;  %v1289_v34 = vmax.f32 %v1273_v61, 0.0  ;;  %v1290_v36 = vmax.f32 %v1274_v6, 0.0 }
 0x2a7   :  { %1298 = vst.msk [vmem:[%s2672_s5 + $0x18] sm:$0xff] %vm881_vm3, %v1282_v10  ;;  %v1277_v32 = vadd.f32 %v1261_v57, %v1258_v14  ;;  %v1278_v35 = vadd.f32 %v1261_v57, %v1259_v1  ;;  %v1291_v43 = vmax.f32 %v1275_v19, 0.0 }
 0x2a8   :  { %1299 = vst.msk [vmem:[%s2672_s5 + $0x20] sm:$0xff] %vm881_vm3, %v1283_v17  ;;  %v1292_v39 = vmax.f32 %v1276_v20, 0.0 }
 0x2a9   :  { %1300 = vst.msk [vmem:[%s2672_s5 + $0x28] sm:$0xff] %vm881_vm3, %v1284_v38  ;;  %v1293_v50 = vmax.f32 %v1277_v32, 0.0  ;;  %v1294_v0 = vmax.f32 %v1278_v35, 0.0 }
 0x2aa   :  { %1301 = vst.msk [vmem:[%s2672_s5 + $0x30] sm:$0xff] %vm881_vm3, %v1285_v28 }
 0x2ab   :  { %1302 = vst.msk [vmem:[%s2672_s5 + $0x38] sm:$0xff] %vm881_vm3, %v1286_v31 }
 0x2ac   :  { %1303 = vst.msk [vmem:[%s2672_s5 + $0x40] sm:$0xff] %vm881_vm3, %v1287_v62 }
 0x2ad   :  { %1304 = vst.msk [vmem:[%s2672_s5 + $0x48] sm:$0xff] %vm881_vm3, %v1288_v33 }
 0x2ae   :  { %1305 = vst.msk [vmem:[%s2672_s5 + $0x50] sm:$0xff] %vm881_vm3, %v1289_v34 }
 0x2af   :  { %1306 = vst.msk [vmem:[%s2672_s5 + $0x58] sm:$0xff] %vm881_vm3, %v1290_v36 }
 0x2b0   :  { %1307 = vst.msk [vmem:[%s2672_s5 + $0x60] sm:$0xff] %vm881_vm3, %v1291_v43 }
 0x2b1   :  { %1308 = vst.msk [vmem:[%s2672_s5 + $0x68] sm:$0xff] %vm881_vm3, %v1292_v39 }
 0x2b2   :  { %1309 = vst.msk [vmem:[%s2672_s5 + $0x70] sm:$0xff] %vm881_vm3, %v1293_v50 }
 0x2b3   :  { %1310 = vst.msk [vmem:[%s2672_s5 + $0x78] sm:$0xff] %vm881_vm3, %v1294_v0 }

</bundles_post_ra>
